<compile_context>
chip_gen: v7x
topology: tpu7x:2x2x1
jax: 0.10.0
libtpu: 0.0.40
codegen_flags: <defaults>
</compile_context>

<pallas_src>
import jax
import jax.numpy as jnp
from jax.experimental import pallas as pl
from jax.experimental.pallas import tpu as pltpu

D_HIDDEN = 256   # hidden width fixed by the module (Linear(dim_mlp, 256), ResidualMLPBlock(256))
D_OUT = 128      # mlp_branch output width (Linear(256, 128))


def _round_up(n, m):
    return (n + m - 1) // m * m


def _hw_info():
    """Best-effort TensorCore count + per-core VMEM capacity, with safe fallbacks."""
    num_tc, vmem_cap = 1, 64 << 20
    try:
        info = pltpu.get_tpu_info()
        vmem_cap = int(getattr(info, "vmem_capacity_bytes", vmem_cap))
        for name in ("num_cores", "core_count", "num_tensorcores", "tensorcores_per_chip"):
            v = getattr(info, name, None)
            if v:
                num_tc = int(v)
                break
    except Exception:
        pass
    return num_tc, vmem_cap


def mlp_branch_kernel(x_ref, win_ref, bin_ref,
                      w11_ref, t11_ref, w12_ref, t12_ref,
                      w21_ref, t21_ref, w22_ref, t22_ref,
                      wout_ref, bout_ref, o_ref):
    wdt = win_ref.dtype                       # bf16 (default) or f32 MXU path
    x = x_ref[...]                            # (bm, Din_p) f32

    # Linear(dim_mlp -> 256); no activation before the first residual block.
    h = jnp.dot(x.astype(wdt), win_ref[...], preferred_element_type=jnp.float32) + bin_ref[...]

    # ResidualMLPBlock #1  (BN folded into weights/shifts; Dropout(0.1) = identity in eval)
    a = jnp.dot(h.astype(wdt), w11_ref[...], preferred_element_type=jnp.float32) + t11_ref[...]
    a = jnp.maximum(a, 0.0)
    y = jnp.dot(a.astype(wdt), w12_ref[...], preferred_element_type=jnp.float32) + t12_ref[...]
    h = jnp.maximum(y + h, 0.0)               # residual add + ReLU, f32 epilogue

    # ResidualMLPBlock #2
    a = jnp.dot(h.astype(wdt), w21_ref[...], preferred_element_type=jnp.float32) + t21_ref[...]
    a = jnp.maximum(a, 0.0)
    y = jnp.dot(a.astype(wdt), w22_ref[...], preferred_element_type=jnp.float32) + t22_ref[...]
    h = jnp.maximum(y + h, 0.0)

    # Linear(256 -> 128); no activation after (feeds the fusion concat).
    o = jnp.dot(h.astype(wdt), wout_ref[...], preferred_element_type=jnp.float32) + bout_ref[...]
    o_ref[...] = o.astype(o_ref.dtype)


def mlp_branch_forward(x, folded, *, max_block_b=1024):
    """x: (B, dim_mlp) f32. folded: tuple from fold_params(). Returns (B, 128) f32."""
    (win, bin_, w11, t11, w12, t12, w21, t21, w22, t22, wout, bout) = folded
    B, din = x.shape
    if din != win.shape[0]:
        raise ValueError("x feature dim does not match folded Win")

    # Pad the first contraction dim to a lane multiple (zero columns/rows are inert).
    din_p = _round_up(din, 128)
    if din_p != din:
        x = jnp.pad(x, ((0, 0), (0, din_p - din)))
        win = jnp.pad(win, ((0, din_p - din), (0, 0)))

    num_tc, vmem_cap = _hw_info()

    # Overhead/DMA-bound regime: fewest, fattest grid steps.
    #   1 TC (v5e/v6e) -> exactly 1 step; 2 TCs (v7x) -> exactly 2 steps so the "parallel"
    #   batch axis really lands on both cores. Cap the tile for VMEM safety at huge B.
    bm = _round_up(max(8, pl.cdiv(B, max(1, num_tc))), 8)
    bm = min(bm, max(8, _round_up(max_block_b, 8)))
    Bp = _round_up(B, bm)
    xp = jnp.pad(x, ((0, Bp - B), (0, 0))) if Bp != B else x
    grid = (Bp // bm,)

    weights = (win, w11, w12, w21, w22, wout)
    biases = (bin_, t11, t12, t21, t22, bout)
    wbytes = sum(int(w.size) * w.dtype.itemsize for w in weights)
    bbytes = sum(int(b.size) * b.dtype.itemsize for b in biases)
    io_bytes = Bp * din_p * x.dtype.itemsize + Bp * D_OUT * x.dtype.itemsize
    flops = 2 * Bp * (din_p * D_HIDDEN + 4 * D_HIDDEN * D_HIDDEN + D_HIDDEN * D_OUT)
    cost = pl.CostEstimate(flops=flops, transcendentals=0,
                           bytes_accessed=wbytes + bbytes + io_bytes)

    # VMEM: double-buffered x/out tiles + resident weights/shifts (worst case x2 buffers)
    # + live f32 intermediates (~4 x (bm, 256)).
    need = (2 * bm * (din_p + D_OUT) * 4
            + 2 * (wbytes + bbytes)
            + 4 * bm * D_HIDDEN * 4)
    vmem_limit = int(min(int(0.75 * vmem_cap), max(need + (8 << 20), 16 << 20)))
    vmem_limit = max(vmem_limit, need + (2 << 20))

    def const2(shape):
        # Constant block index -> Pallas keeps the block resident across grid steps.
        return pl.BlockSpec(shape, lambda i: (0, 0))

    in_specs = [
        pl.BlockSpec((bm, din_p), lambda i: (i, 0)),      # x tile (batch-sharded)
        const2(win.shape), const2(bin_.shape),            # Linear-in
        const2(w11.shape), const2(t11.shape),             # block1 Lin1+BN1 (folded)
        const2(w12.shape), const2(t12.shape),             # block1 Lin2+BN2 (folded)
        const2(w21.shape), const2(t21.shape),             # block2 Lin1+BN1 (folded)
        const2(w22.shape), const2(t22.shape),             # block2 Lin2+BN2 (folded)
        const2(wout.shape), const2(bout.shape),           # Linear-out
    ]

    out = pl.pallas_call(
        mlp_branch_kernel,
        out_shape=jax.ShapeDtypeStruct((Bp, D_OUT), x.dtype),
        grid_spec=pltpu.PrefetchScalarGridSpec(
            num_scalar_prefetch=0,
            grid=grid,
            in_specs=in_specs,
            out_specs=pl.BlockSpec((bm, D_OUT), lambda i: (i, 0)),
        ),
        compiler_params=pltpu.CompilerParams(
            dimension_semantics=("parallel",),            # batch axis -> both TCs on v7x
            vmem_limit_bytes=vmem_limit),
        cost_estimate=cost,
    )(xp, win, bin_, w11, t11, w12, t12, w21, t21, w22, t22, wout, bout)

    return out[:B] if Bp != B else out


# ----------------------------- parameter construction -----------------------------

def _linear_params(key, out_dim, in_dim):
    kw, kb = jax.random.split(key)
    bound = 1.0 / jnp.sqrt(in_dim)
    W = jax.random.uniform(kw, (out_dim, in_dim), jnp.float32, -bound, bound)
    b = jax.random.uniform(kb, (out_dim,), jnp.float32, -bound, bound)
    return W, b


def _bn_params(key, dim):
    k = jax.random.split(key, 4)
    g = 1.0 + 0.1 * jax.random.normal(k[0], (dim,), jnp.float32)
    be = 0.1 * jax.random.normal(k[1], (dim,), jnp.float32)
    m = 0.1 * jax.random.normal(k[2], (dim,), jnp.float32)
    v = jax.random.uniform(k[3], (dim,), jnp.float32, 0.5, 1.5)
    return g, be, m, v


def _block_params(key, dim):
    k = jax.random.split(key, 4)
    W1, b1 = _linear_params(k[0], dim, dim)
    g1, be1, m1, v1 = _bn_params(k[1], dim)
    W2, b2 = _linear_params(k[2], dim, dim)
    g2, be2, m2, v2 = _bn_params(k[3], dim)
    return dict(W1=W1, b1=b1, g1=g1, be1=be1, m1=m1, v1=v1,
                W2=W2, b2=b2, g2=g2, be2=be2, m2=m2, v2=v2)


def make_params(key, dim_mlp):
    """Synthetic params matching nn.Linear / nn.BatchNorm1d shapes of mlp_branch."""
    k = jax.random.split(key, 4)
    Win, bin_ = _linear_params(k[0], D_HIDDEN, dim_mlp)
    blk1 = _block_params(k[1], D_HIDDEN)
    blk2 = _block_params(k[2], D_HIDDEN)
    Wout, bout = _linear_params(k[3], D_OUT, D_HIDDEN)
    return dict(Win=Win, bin=bin_, blk1=blk1, blk2=blk2, Wout=Wout, bout=bout)


def _fold_block(q, eps, weight_dtype):
    # BN(Lin(x)) = x @ (W.T * s) + (b*s + beta - m*s),  s = g / sqrt(v + eps)
    s1 = q["g1"] / jnp.sqrt(q["v1"] + eps)
    s2 = q["g2"] / jnp.sqrt(q["v2"] + eps)
    w1 = (q["W1"].T * s1[None, :]).astype(weight_dtype)
    w2 = (q["W2"].T * s2[None, :]).astype(weight_dtype)
    t1 = (q["b1"] * s1 + q["be1"] - q["m1"] * s1).reshape(1, -1).astype(jnp.float32)
    t2 = (q["b2"] * s2 + q["be2"] - q["m2"] * s2).reshape(1, -1).astype(jnp.float32)
    return w1, t1, w2, t2


def fold_params(p, eps=1e-5, weight_dtype=jnp.bfloat16):
    """Pre-transpose Linear weights and fold BN running stats.

    bf16 weights by default (MXU fast path / half the weight DMA); all biases/shifts and
    the in-kernel accumulation + epilogue stay f32.
    """
    win = p["Win"].T.astype(weight_dtype)
    bin_ = p["bin"].reshape(1, -1).astype(jnp.float32)
    w11, t11, w12, t12 = _fold_block(p["blk1"], eps, weight_dtype)
    w21, t21, w22, t22 = _fold_block(p["blk2"], eps, weight_dtype)
    wout = p["Wout"].T.astype(weight_dtype)
    bout = p["bout"].reshape(1, -1).astype(jnp.float32)
    return (win, bin_, w11, t11, w12, t12, w21, t21, w22, t22, wout, bout)


def reference(x, p, eps=1e-5):
    """Pure-JAX eval-mode mlp_branch forward (mirrors the PyTorch module)."""
    h = x @ p["Win"].T + p["bin"]
    for name in ("blk1", "blk2"):
        q = p[name]
        a = h @ q["W1"].T + q["b1"]
        a = (a - q["m1"]) / jnp.sqrt(q["v1"] + eps) * q["g1"] + q["be1"]
        a = jnp.maximum(a, 0.0)                    # Dropout(0.1) identity in eval
        y = a @ q["W2"].T + q["b2"]
        y = (y - q["m2"]) / jnp.sqrt(q["v2"] + eps) * q["g2"] + q["be2"]
        h = jnp.maximum(y + h, 0.0)
    return h @ p["Wout"].T + p["bout"]


if __name__ == "__main__":
    # Small demo shapes consistent with the module: mlp_features (batch, dim_mlp) -> (batch, 128).
    # Both axes are ragged to exercise the padding paths (dim_mlp pads to 128, batch to the tile).
    batch, dim_mlp = 12, 100
    key = jax.random.PRNGKey(0)
    kx, kp = jax.random.split(key)
    x = jax.random.normal(kx, (batch, dim_mlp), jnp.float32)
    params = make_params(kp, dim_mlp)
    ref = reference(x, params)

    # f32 weight path (tight check)
    out_f32 = mlp_branch_forward(x, fold_params(params, weight_dtype=jnp.float32))
    out_f32 = jax.block_until_ready(out_f32)
    assert out_f32.shape == (batch, D_OUT)
    assert jnp.max(jnp.abs(out_f32 - ref)) < 5e-4, "f32 kernel mismatch vs reference"

    # Default path: bf16 weights / MXU inputs, f32 accumulation + epilogue
    out_bf16 = mlp_branch_forward(x, fold_params(params))
    out_bf16 = jax.block_until_ready(out_bf16)
    assert out_bf16.shape == (batch, D_OUT)
    scale = float(jnp.maximum(1.0, jnp.max(jnp.abs(ref))))
    assert jnp.max(jnp.abs(out_bf16 - ref)) < 6e-2 * scale, "bf16 kernel mismatch vs reference"

    print("KERNEL_OK")
</pallas_src>

<mosaic_0001>
module attributes {stable_mosaic.version = 11 : i64} {
  func.func @mlp_branch_kernel(%arg0: i32, %arg1: memref<16x128xf32, #tpu.memory_space<vmem>>, %arg2: memref<128x256xf32, #tpu.memory_space<vmem>>, %arg3: memref<1x256xf32, #tpu.memory_space<vmem>>, %arg4: memref<256x256xf32, #tpu.memory_space<vmem>>, %arg5: memref<1x256xf32, #tpu.memory_space<vmem>>, %arg6: memref<256x256xf32, #tpu.memory_space<vmem>>, %arg7: memref<1x256xf32, #tpu.memory_space<vmem>>, %arg8: memref<256x256xf32, #tpu.memory_space<vmem>>, %arg9: memref<1x256xf32, #tpu.memory_space<vmem>>, %arg10: memref<256x256xf32, #tpu.memory_space<vmem>>, %arg11: memref<1x256xf32, #tpu.memory_space<vmem>>, %arg12: memref<256x128xf32, #tpu.memory_space<vmem>>, %arg13: memref<1x128xf32, #tpu.memory_space<vmem>>, %arg14: memref<16x128xf32, #tpu.memory_space<vmem>>) attributes {dimension_semantics = [#tpu.dimension_semantics<parallel>], iteration_bounds = array<i64: 1>, scalar_prefetch = 0 : i64, scratch_operands = 0 : i64, tpu.core_type = #tpu.core_type<tc>, window_params = [{transform_indices = @transform_0, window_bounds = array<i64: 16, 128>}, {pipeline_mode = #tpu.pipeline_mode<synchronous>, transform_indices = @transform_1, window_bounds = array<i64: 128, 256>}, {pipeline_mode = #tpu.pipeline_mode<synchronous>, transform_indices = @transform_2, window_bounds = array<i64: 1, 256>}, {pipeline_mode = #tpu.pipeline_mode<synchronous>, transform_indices = @transform_3, window_bounds = array<i64: 256, 256>}, {pipeline_mode = #tpu.pipeline_mode<synchronous>, transform_indices = @transform_4, window_bounds = array<i64: 1, 256>}, {pipeline_mode = #tpu.pipeline_mode<synchronous>, transform_indices = @transform_5, window_bounds = array<i64: 256, 256>}, {pipeline_mode = #tpu.pipeline_mode<synchronous>, transform_indices = @transform_6, window_bounds = array<i64: 1, 256>}, {pipeline_mode = #tpu.pipeline_mode<synchronous>, transform_indices = @transform_7, window_bounds = array<i64: 256, 256>}, {pipeline_mode = #tpu.pipeline_mode<synchronous>, transform_indices = @transform_8, window_bounds = array<i64: 1, 256>}, {pipeline_mode = #tpu.pipeline_mode<synchronous>, transform_indices = @transform_9, window_bounds = array<i64: 256, 256>}, {pipeline_mode = #tpu.pipeline_mode<synchronous>, transform_indices = @transform_10, window_bounds = array<i64: 1, 256>}, {pipeline_mode = #tpu.pipeline_mode<synchronous>, transform_indices = @transform_11, window_bounds = array<i64: 256, 128>}, {pipeline_mode = #tpu.pipeline_mode<synchronous>, transform_indices = @transform_12, window_bounds = array<i64: 1, 128>}, {transform_indices = @transform_13, window_bounds = array<i64: 16, 128>}]} {
    %c0 = arith.constant 0 : index
    %c0_0 = arith.constant 0 : index
    %0 = vector.load %arg1[%c0, %c0_0] : memref<16x128xf32, #tpu.memory_space<vmem>>, vector<16x128xf32>
    %c0_1 = arith.constant 0 : index
    %c0_2 = arith.constant 0 : index
    %1 = vector.load %arg2[%c0_1, %c0_2] : memref<128x256xf32, #tpu.memory_space<vmem>>, vector<128x256xf32>
    %cst = arith.constant dense<0.000000e+00> : vector<16x256xf32>
    %2 = tpu.matmul %0, %1, %cst {dimension_numbers = #tpu.dot_dimension_numbers<[1], [0], [0], [1], [0, 0, 1, 1], [], []>} : vector<16x128xf32>, vector<128x256xf32>, vector<16x256xf32> -> vector<16x256xf32>
    %c0_3 = arith.constant 0 : index
    %c0_4 = arith.constant 0 : index
    %3 = vector.load %arg3[%c0_3, %c0_4] : memref<1x256xf32, #tpu.memory_space<vmem>>, vector<1x256xf32>
    %4 = vector.broadcast %3 : vector<1x256xf32> to vector<16x256xf32>
    %5 = arith.addf %2, %4 : vector<16x256xf32>
    %c0_5 = arith.constant 0 : index
    %c0_6 = arith.constant 0 : index
    %6 = vector.load %arg4[%c0_5, %c0_6] : memref<256x256xf32, #tpu.memory_space<vmem>>, vector<256x256xf32>
    %cst_7 = arith.constant dense<0.000000e+00> : vector<16x256xf32>
    %7 = tpu.matmul %5, %6, %cst_7 {dimension_numbers = #tpu.dot_dimension_numbers<[1], [0], [0], [1], [0, 0, 1, 1], [], []>} : vector<16x256xf32>, vector<256x256xf32>, vector<16x256xf32> -> vector<16x256xf32>
    %c0_8 = arith.constant 0 : index
    %c0_9 = arith.constant 0 : index
    %8 = vector.load %arg5[%c0_8, %c0_9] : memref<1x256xf32, #tpu.memory_space<vmem>>, vector<1x256xf32>
    %9 = vector.broadcast %8 : vector<1x256xf32> to vector<16x256xf32>
    %10 = arith.addf %7, %9 : vector<16x256xf32>
    %cst_10 = arith.constant 0.000000e+00 : f32
    %11 = vector.broadcast %cst_10 : f32 to vector<16x256xf32>
    %12 = arith.maximumf %10, %11 : vector<16x256xf32>
    %c0_11 = arith.constant 0 : index
    %c0_12 = arith.constant 0 : index
    %13 = vector.load %arg6[%c0_11, %c0_12] : memref<256x256xf32, #tpu.memory_space<vmem>>, vector<256x256xf32>
    %cst_13 = arith.constant dense<0.000000e+00> : vector<16x256xf32>
    %14 = tpu.matmul %12, %13, %cst_13 {dimension_numbers = #tpu.dot_dimension_numbers<[1], [0], [0], [1], [0, 0, 1, 1], [], []>} : vector<16x256xf32>, vector<256x256xf32>, vector<16x256xf32> -> vector<16x256xf32>
    %c0_14 = arith.constant 0 : index
    %c0_15 = arith.constant 0 : index
    %15 = vector.load %arg7[%c0_14, %c0_15] : memref<1x256xf32, #tpu.memory_space<vmem>>, vector<1x256xf32>
    %16 = vector.broadcast %15 : vector<1x256xf32> to vector<16x256xf32>
    %17 = arith.addf %14, %16 : vector<16x256xf32>
    %18 = arith.addf %17, %5 : vector<16x256xf32>
    %cst_16 = arith.constant 0.000000e+00 : f32
    %19 = vector.broadcast %cst_16 : f32 to vector<16x256xf32>
    %20 = arith.maximumf %18, %19 : vector<16x256xf32>
    %c0_17 = arith.constant 0 : index
    %c0_18 = arith.constant 0 : index
    %21 = vector.load %arg8[%c0_17, %c0_18] : memref<256x256xf32, #tpu.memory_space<vmem>>, vector<256x256xf32>
    %cst_19 = arith.constant dense<0.000000e+00> : vector<16x256xf32>
    %22 = tpu.matmul %20, %21, %cst_19 {dimension_numbers = #tpu.dot_dimension_numbers<[1], [0], [0], [1], [0, 0, 1, 1], [], []>} : vector<16x256xf32>, vector<256x256xf32>, vector<16x256xf32> -> vector<16x256xf32>
    %c0_20 = arith.constant 0 : index
    %c0_21 = arith.constant 0 : index
    %23 = vector.load %arg9[%c0_20, %c0_21] : memref<1x256xf32, #tpu.memory_space<vmem>>, vector<1x256xf32>
    %24 = vector.broadcast %23 : vector<1x256xf32> to vector<16x256xf32>
    %25 = arith.addf %22, %24 : vector<16x256xf32>
    %cst_22 = arith.constant 0.000000e+00 : f32
    %26 = vector.broadcast %cst_22 : f32 to vector<16x256xf32>
    %27 = arith.maximumf %25, %26 : vector<16x256xf32>
    %c0_23 = arith.constant 0 : index
    %c0_24 = arith.constant 0 : index
    %28 = vector.load %arg10[%c0_23, %c0_24] : memref<256x256xf32, #tpu.memory_space<vmem>>, vector<256x256xf32>
    %cst_25 = arith.constant dense<0.000000e+00> : vector<16x256xf32>
    %29 = tpu.matmul %27, %28, %cst_25 {dimension_numbers = #tpu.dot_dimension_numbers<[1], [0], [0], [1], [0, 0, 1, 1], [], []>} : vector<16x256xf32>, vector<256x256xf32>, vector<16x256xf32> -> vector<16x256xf32>
    %c0_26 = arith.constant 0 : index
    %c0_27 = arith.constant 0 : index
    %30 = vector.load %arg11[%c0_26, %c0_27] : memref<1x256xf32, #tpu.memory_space<vmem>>, vector<1x256xf32>
    %31 = vector.broadcast %30 : vector<1x256xf32> to vector<16x256xf32>
    %32 = arith.addf %29, %31 : vector<16x256xf32>
    %33 = arith.addf %32, %20 : vector<16x256xf32>
    %cst_28 = arith.constant 0.000000e+00 : f32
    %34 = vector.broadcast %cst_28 : f32 to vector<16x256xf32>
    %35 = arith.maximumf %33, %34 : vector<16x256xf32>
    %c0_29 = arith.constant 0 : index
    %c0_30 = arith.constant 0 : index
    %36 = vector.load %arg12[%c0_29, %c0_30] : memref<256x128xf32, #tpu.memory_space<vmem>>, vector<256x128xf32>
    %cst_31 = arith.constant dense<0.000000e+00> : vector<16x128xf32>
    %37 = tpu.matmul %35, %36, %cst_31 {dimension_numbers = #tpu.dot_dimension_numbers<[1], [0], [0], [1], [0, 0, 1, 1], [], []>} : vector<16x256xf32>, vector<256x128xf32>, vector<16x128xf32> -> vector<16x128xf32>
    %c0_32 = arith.constant 0 : index
    %c0_33 = arith.constant 0 : index
    %38 = vector.load %arg13[%c0_32, %c0_33] : memref<1x128xf32, #tpu.memory_space<vmem>>, vector<1x128xf32>
    %39 = vector.broadcast %38 : vector<1x128xf32> to vector<16x128xf32>
    %40 = arith.addf %37, %39 : vector<16x128xf32>
    %c0_34 = arith.constant 0 : index
    %c0_35 = arith.constant 0 : index
    %41 = vector.load %arg14[%c0_34, %c0_35] : memref<16x128xf32, #tpu.memory_space<vmem>>, vector<16x128xf32>
    tpu.vector_store %arg14[%c0_34, %c0_35], %40 {strides = array<i32>} : memref<16x128xf32, #tpu.memory_space<vmem>>, vector<16x128xf32>,
    return
  }
  func.func @transform_0(%arg0: i32) -> (i32, i32) {
    %c0_i32 = arith.constant 0 : i32
    %c0_i32_0 = arith.constant 0 : i32
    return %arg0, %c0_i32 : i32, i32
  }
  func.func @transform_1(%arg0: i32) -> (i32, i32) {
    %c0_i32 = arith.constant 0 : i32
    %c0_i32_0 = arith.constant 0 : i32
    %c0_i32_1 = arith.constant 0 : i32
    return %c0_i32, %c0_i32_0 : i32, i32
  }
  func.func @transform_2(%arg0: i32) -> (i32, i32) {
    %c0_i32 = arith.constant 0 : i32
    %c0_i32_0 = arith.constant 0 : i32
    %c0_i32_1 = arith.constant 0 : i32
    return %c0_i32, %c0_i32_0 : i32, i32
  }
  func.func @transform_3(%arg0: i32) -> (i32, i32) {
    %c0_i32 = arith.constant 0 : i32
    %c0_i32_0 = arith.constant 0 : i32
    %c0_i32_1 = arith.constant 0 : i32
    return %c0_i32, %c0_i32_0 : i32, i32
  }
  func.func @transform_4(%arg0: i32) -> (i32, i32) {
    %c0_i32 = arith.constant 0 : i32
    %c0_i32_0 = arith.constant 0 : i32
    %c0_i32_1 = arith.constant 0 : i32
    return %c0_i32, %c0_i32_0 : i32, i32
  }
  func.func @transform_5(%arg0: i32) -> (i32, i32) {
    %c0_i32 = arith.constant 0 : i32
    %c0_i32_0 = arith.constant 0 : i32
    %c0_i32_1 = arith.constant 0 : i32
    return %c0_i32, %c0_i32_0 : i32, i32
  }
  func.func @transform_6(%arg0: i32) -> (i32, i32) {
    %c0_i32 = arith.constant 0 : i32
    %c0_i32_0 = arith.constant 0 : i32
    %c0_i32_1 = arith.constant 0 : i32
    return %c0_i32, %c0_i32_0 : i32, i32
  }
  func.func @transform_7(%arg0: i32) -> (i32, i32) {
    %c0_i32 = arith.constant 0 : i32
    %c0_i32_0 = arith.constant 0 : i32
    %c0_i32_1 = arith.constant 0 : i32
    return %c0_i32, %c0_i32_0 : i32, i32
  }
  func.func @transform_8(%arg0: i32) -> (i32, i32) {
    %c0_i32 = arith.constant 0 : i32
    %c0_i32_0 = arith.constant 0 : i32
    %c0_i32_1 = arith.constant 0 : i32
    return %c0_i32, %c0_i32_0 : i32, i32
  }
  func.func @transform_9(%arg0: i32) -> (i32, i32) {
    %c0_i32 = arith.constant 0 : i32
    %c0_i32_0 = arith.constant 0 : i32
    %c0_i32_1 = arith.constant 0 : i32
    return %c0_i32, %c0_i32_0 : i32, i32
  }
  func.func @transform_10(%arg0: i32) -> (i32, i32) {
    %c0_i32 = arith.constant 0 : i32
    %c0_i32_0 = arith.constant 0 : i32
    %c0_i32_1 = arith.constant 0 : i32
    return %c0_i32, %c0_i32_0 : i32, i32
  }
  func.func @transform_11(%arg0: i32) -> (i32, i32) {
    %c0_i32 = arith.constant 0 : i32
    %c0_i32_0 = arith.constant 0 : i32
    %c0_i32_1 = arith.constant 0 : i32
    return %c0_i32, %c0_i32_0 : i32, i32
  }
  func.func @transform_12(%arg0: i32) -> (i32, i32) {
    %c0_i32 = arith.constant 0 : i32
    %c0_i32_0 = arith.constant 0 : i32
    %c0_i32_1 = arith.constant 0 : i32
    return %c0_i32, %c0_i32_0 : i32, i32
  }
  func.func @transform_13(%arg0: i32) -> (i32, i32) {
    %c0_i32 = arith.constant 0 : i32
    %c0_i32_0 = arith.constant 0 : i32
    return %arg0, %c0_i32 : i32, i32
  }
}

</mosaic_0001>

<bundles_post_ra>
// kernel: tpu_custom_call.1
= control target key start
LH: loop header
LB: loop body
LE: loop exit
PB: predicated region body
PF: predicated region fallthrough
CT: control target
= control target key end

     0   :  { %18 = vsyncpa [#allocation3], 0  ;;  %s1881_s0 = inlined_call_operand.hbm [shape: f32[16,128], index: 0, kind: input, shape index: {}]   ;;  %s1882_s1 = inlined_call_operand.hbm [shape: f32[128,256], index: 1, kind: input, shape index: {}]   ;;  %s1883_s2 = inlined_call_operand.vmem [shape: f32[1,256], index: 2, kind: input, shape index: {}]   ;;  %s1884_s3 = inlined_call_operand.hbm [shape: f32[256,256], index: 3, kind: input, shape index: {}]   ;;  %s1885_s4 = inlined_call_operand.vmem [shape: f32[1,256], index: 4, kind: input, shape index: {}]   ;;  %s1886_s5 = inlined_call_operand.hbm [shape: f32[256,256], index: 5, kind: input, shape index: {}]   ;;  %s1887_s6 = inlined_call_operand.vmem [shape: f32[1,256], index: 6, kind: input, shape index: {}]   ;;  %s1888_s7 = inlined_call_operand.hbm [shape: f32[256,256], index: 7, kind: input, shape index: {}]   ;;  %s1889_s8 = inlined_call_operand.vmem [shape: f32[1,256], index: 8, kind: input, shape index: {}]   ;;  %s1890_s9 = inlined_call_operand.hbm [shape: f32[256,256], index: 9, kind: input, shape index: {}]   ;;  %s1891_s10 = inlined_call_operand.vmem [shape: f32[1,256], index: 10, kind: input, shape index: {}]   ;;  %s1892_s11 = inlined_call_operand.hbm [shape: f32[256,128], index: 11, kind: input, shape index: {}]   ;;  %s1893_s12 = inlined_call_operand.vmem [shape: f32[1,128], index: 12, kind: input, shape index: {}]   ;;  %s1894_s13 = inlined_call_operand.hbm [shape: f32[16,128], index: 13, kind: output, shape index: {}]  }
   0x1   :  { %19 = vsyncpa [#allocation6], 0 }
   0x2   :  { %20 = vsyncpa [#allocation9], 0 }
   0x3   :  { %21 = vsyncpa [#allocation12], 0 }
   0x4   :  { %22 = vsyncpa [#allocation4], 0  ;;  %s1593_s25 = smov [#allocation5]   ;;  %s1407_s29 = scalar_lea.hbm %s1882_s1, 4096 }
   0x5   :  { %s40_s26 = sshll.u32 %s1593_s25, 4  ;;  %p1408_p0 = scmp.ne.s32.totalorder %s1882_s1, %s1407_s29  ;;  %s41_s26 = int_to_ptr.vmem [resolvable:$true] %s40_s26 }
   0x6   :  { %p1411_p1 = scmp.lt.u32.totalorder %s1407_s29, %s1882_s1 }
   0x8   :  { %p1413_p2 = pnand %p1411_p1, %p1408_p0 }
   0xa   :  { %1416 = shalt.err (!%p1413_p2)
}
   0xb   :  { %s1417_s17 = scalar_lea.vmem %s41_s26, 4096  ;;  %p1422_p4 = scmp.lt.s32.totalorder %s41_s26, %s41_s26 }
   0xc   :  { %p1418_p3 = scmp.ne.s32.totalorder %s41_s26, %s1417_s17  ;;  %p1423_p5 = scmp.lt.s32.totalorder %s1417_s17, %s1417_s17 }
   0xe   :  { %p1424_p6 = por %p1423_p5, %p1422_p4 }
  0x10   :  { %p1425_p7 = pnand %p1424_p6, %p1418_p3 }
  0x12   :  { %1428 = shalt.err (!%p1425_p7)
}
  0x13   :  { %s1594_s18 = smov 256   ;;  %s1595_s19 = smov 16  }
  0x14   :  { %46 = dma.hbm_to_vmem [thread:$0]  %s1882_s1, 4096, %s41_s26, [#allocation6], %s1594_s18, %s1594_s18, %s1595_s19  }
  0x15   :  { %s1596_s22 = smov [#allocation8]   ;;  %s1597_s24 = smov [#allocation11]  }
  0x16   :  { %s68_s23 = sshll.u32 %s1596_s22, 4  ;;  %s96_s25 = sshll.u32 %s1597_s24, 4  ;;  %s69_s23 = int_to_ptr.vmem [resolvable:$true] %s68_s23  ;;  %s97_s25 = int_to_ptr.vmem [resolvable:$true] %s96_s25 }
  0x17   :  { %s1429_s29 = scalar_lea.hbm %s1886_s5, 8192 }
  0x18   :  { %p1430_p8 = scmp.ne.s32.totalorder %s1886_s5, %s1429_s29  ;;  %p1433_p9 = scmp.lt.u32.totalorder %s1429_s29, %s1886_s5 }
  0x1a   :  { %p1435_p10 = pnand %p1433_p9, %p1430_p8 }
  0x1c   :  { %1438 = shalt.err (!%p1435_p10)
}
  0x1d   :  { %s1439_s1 = scalar_lea.vmem %s69_s23, 8192  ;;  %p1444_p12 = scmp.lt.s32.totalorder %s69_s23, %s69_s23 }
  0x1e   :  { %p1440_p11 = scmp.ne.s32.totalorder %s69_s23, %s1439_s1  ;;  %p1445_p13 = scmp.lt.s32.totalorder %s1439_s1, %s1439_s1 }
  0x20   :  { %p1446_p0 = por %p1445_p13, %p1444_p12 }
  0x22   :  { %p1447_p1 = pnand %p1446_p0, %p1440_p11 }
  0x24   :  { %1450 = shalt.err (!%p1447_p1)
}
  0x25   :  { %74 = dma.hbm_to_vmem [thread:$0]  %s1886_s5, 8192, %s69_s23, [#allocation9], %s1594_s18, %s1594_s18, %s1595_s19  }
  0x26   :  { %s1451_s22 = scalar_lea.hbm %s1890_s9, 8192 }
  0x27   :  { %p1452_p2 = scmp.ne.s32.totalorder %s1890_s9, %s1451_s22  ;;  %p1455_p3 = scmp.lt.u32.totalorder %s1451_s22, %s1890_s9 }
  0x29   :  { %p1457_p4 = pnand %p1455_p3, %p1452_p2 }
  0x2b   :  { %1460 = shalt.err (!%p1457_p4)
}
  0x2c   :  { %s1461_s30 = scalar_lea.vmem %s97_s25, 8192  ;;  %p1466_p6 = scmp.lt.s32.totalorder %s97_s25, %s97_s25 }
  0x2d   :  { %p1462_p5 = scmp.ne.s32.totalorder %s97_s25, %s1461_s30  ;;  %p1467_p7 = scmp.lt.s32.totalorder %s1461_s30, %s1461_s30 }
  0x2f   :  { %p1468_p8 = por %p1467_p7, %p1466_p6 }
  0x31   :  { %p1469_p9 = pnand %p1468_p8, %p1462_p5 }
  0x33   :  { %1472 = shalt.err (!%p1469_p9)
}
  0x34   :  { %102 = dma.hbm_to_vmem [thread:$0]  %s1890_s9, 8192, %s97_s25, [#allocation12], %s1594_s18, %s1594_s18, %s1595_s19  }
  0x35   :  { %s1598_s14 = smov [#allocation2]   ;;  %s1473_s26 = scalar_lea.hbm %s1881_s0, 256 }
  0x36   :  { %s28_s15 = sshll.u32 %s1598_s14, 4  ;;  %p1474_p10 = scmp.ne.s32.totalorder %s1881_s0, %s1473_s26  ;;  %s29_s15 = int_to_ptr.vmem [resolvable:$true] %s28_s15 }
  0x37   :  { %p1477_p11 = scmp.lt.u32.totalorder %s1473_s26, %s1881_s0 }
  0x39   :  { %p1479_p12 = pnand %p1477_p11, %p1474_p10 }
  0x3b   :  { %1482 = shalt.err (!%p1479_p12)
}
  0x3c   :  { %s1483_s24 = scalar_lea.vmem %s29_s15, 256  ;;  %p1488_p0 = scmp.lt.s32.totalorder %s29_s15, %s29_s15 }
  0x3d   :  { %p1484_p13 = scmp.ne.s32.totalorder %s29_s15, %s1483_s24  ;;  %p1489_p1 = scmp.lt.s32.totalorder %s1483_s24, %s1483_s24 }
  0x3f   :  { %p1490_p2 = por %p1489_p1, %p1488_p0 }
  0x41   :  { %p1491_p3 = pnand %p1490_p2, %p1484_p13 }
  0x43   :  { %1494 = shalt.err (!%p1491_p3)
}
  0x44   :  { %s1599_s9 = smov 128   ;;  %s1600_s25 = smov 8  }
  0x45   :  { %34 = dma.hbm_to_vmem [thread:$0]  %s1881_s0, 256, %s29_s15, [#allocation3], %s1599_s9, %s1599_s9, %s1600_s25  }
  0x46   :  { %s1601_s29 = smov [#allocation7]   ;;  %s1602_s5 = smov [#allocation10]  }
  0x47   :  { %s54_s30 = sshll.u32 %s1601_s29, 4  ;;  %s82_s23 = sshll.u32 %s1602_s5, 4  ;;  %s55_s30 = int_to_ptr.vmem [resolvable:$true] %s54_s30  ;;  %s1736_s23 = int_to_ptr.vmem [resolvable:$true] %s82_s23 }
  0x48   :  { %s1495_s1 = scalar_lea.hbm %s1884_s3, 8192 }
  0x49   :  { %p1496_p4 = scmp.ne.s32.totalorder %s1884_s3, %s1495_s1  ;;  %p1499_p5 = scmp.lt.u32.totalorder %s1495_s1, %s1884_s3 }
  0x4b   :  { %p1501_p6 = pnand %p1499_p5, %p1496_p4 }
  0x4d   :  { %1504 = shalt.err (!%p1501_p6)
}
  0x4e   :  { %s1505_s0 = scalar_lea.vmem %s55_s30, 8192  ;;  %p1510_p8 = scmp.lt.s32.totalorder %s55_s30, %s55_s30 }
  0x4f   :  { %p1506_p7 = scmp.ne.s32.totalorder %s55_s30, %s1505_s0  ;;  %p1511_p9 = scmp.lt.s32.totalorder %s1505_s0, %s1505_s0 }
  0x51   :  { %p1512_p10 = por %p1511_p9, %p1510_p8 }
  0x53   :  { %p1513_p11 = pnand %p1512_p10, %p1506_p7 }
  0x55   :  { %1516 = shalt.err (!%p1513_p11)
}
  0x56   :  { %60 = dma.hbm_to_vmem [thread:$0]  %s1884_s3, 8192, %s55_s30, [#allocation6], %s1594_s18, %s1594_s18, %s1595_s19  }
  0x57   :  { %s1517_s28 = scalar_lea.hbm %s1888_s7, 8192 }
  0x58   :  { %p1518_p12 = scmp.ne.s32.totalorder %s1888_s7, %s1517_s28  ;;  %p1521_p13 = scmp.lt.u32.totalorder %s1517_s28, %s1888_s7 }
  0x5a   :  { %p1523_p0 = pnand %p1521_p13, %p1518_p12 }
  0x5c   :  { %1526 = shalt.err (!%p1523_p0)
}
  0x5d   :  { %s1527_s1 = scalar_lea.vmem %s1736_s23, 8192  ;;  %p1532_p2 = scmp.lt.s32.totalorder %s1736_s23, %s1736_s23 }
  0x5e   :  { %p1528_p1 = scmp.ne.s32.totalorder %s1736_s23, %s1527_s1  ;;  %p1533_p3 = scmp.lt.s32.totalorder %s1527_s1, %s1527_s1 }
  0x60   :  { %p1534_p4 = por %p1533_p3, %p1532_p2 }
  0x62   :  { %p1535_p5 = pnand %p1534_p4, %p1528_p1 }
  0x64   :  { %1538 = shalt.err (!%p1535_p5)
}
  0x65   :  { %88 = dma.hbm_to_vmem [thread:$0]  %s1888_s7, 8192, %s1736_s23, [#allocation9], %s1594_s18, %s1594_s18, %s1595_s19  }
  0x66   :  { %s1603_s26 = smov [#allocation13]   ;;  %s1539_s0 = scalar_lea.hbm %s1892_s11, 4096 }
  0x67   :  { %s110_s17 = sshll.u32 %s1603_s26, 4  ;;  %p1540_p6 = scmp.ne.s32.totalorder %s1892_s11, %s1539_s0  ;;  %s111_s17 = int_to_ptr.vmem [resolvable:$true] %s110_s17 }
  0x68   :  { %p1543_p7 = scmp.lt.u32.totalorder %s1539_s0, %s1892_s11 }
  0x6a   :  { %p1545_p8 = pnand %p1543_p7, %p1540_p6 }
  0x6c   :  { %1548 = shalt.err (!%p1545_p8)
}
  0x6d   :  { %s1549_s28 = scalar_lea.vmem %s111_s17, 4096  ;;  %p1554_p10 = scmp.lt.s32.totalorder %s111_s17, %s111_s17 }
  0x6e   :  { %p1550_p9 = scmp.ne.s32.totalorder %s111_s17, %s1549_s28  ;;  %p1555_p11 = scmp.lt.s32.totalorder %s1549_s28, %s1549_s28 }
  0x70   :  { %p1556_p12 = por %p1555_p11, %p1554_p10 }
  0x72   :  { %p1557_p13 = pnand %p1556_p12, %p1550_p9 }
  0x74   :  { %1560 = shalt.err (!%p1557_p13)
}
  0x75   :  { %116 = dma.hbm_to_vmem [thread:$0]  %s1892_s11, 4096, %s111_s17, [#allocation12], %s1599_s9, %s1599_s9, %s1600_s25  }
  0x76   :  { %1583 = dma.done.wait [#allocation3], 256  }
  0x77   :  { %1584 = vsyncadd [#allocation3], 4294967040 }
  0x78   :  { %1585 = dma.done.wait [#allocation6], 12288  }
  0x79   :  { %1586 = vsyncadd [#allocation6], 4294955008 }
  0x7a   :  { %1587 = dma.done.wait [#allocation9], 16384  }
  0x7b   :  { %1588 = vsyncadd [#allocation9], 4294950912 }
  0x7c   :  { %1589 = dma.done.wait [#allocation12], 12288  }
  0x7d   :  { %1590 = vsyncadd [#allocation12], 4294955008  ;;  %v1604_v0 = vmov 0.0   ;;  %v143_v1 = vld [vmem:[#allocation5 + $0x8] sm:$0xff]  ;;  %v145_v2 = vld [vmem:[#allocation5 + $0x18] sm:$0xff]  ;;  %s1605_s1 = smov [#allocation14]  }
  0x7e   :  { %250 = vmatprep.mubr.f32.mxu0 %v1604_v0  ;;  %v142_v3 = vld [vmem:[#allocation5] sm:$0xff]  ;;  %v1074_v4 = vpack.c.bf16 %v145_v2, %v143_v1  ;;  %v144_v5 = vld [vmem:[#allocation5 + $0x10] sm:$0xff]  ;;  %v147_v6 = vld [vmem:[#allocation5 + $0x28] sm:$0xff]  ;;  %s1020_s3 = sshll.u32 %s1605_s1, 4  ;;  %s1021_s3 = int_to_ptr.vmem [resolvable:$true] %s1020_s3 }
  0x7f   :  { %v149_v7 = vld [vmem:[#allocation5 + $0x38] sm:$0xff]  ;;  %v1076_v8 = vpack.c.bf16 %v144_v5, %v142_v3  ;;  %v146_v10 = vld [vmem:[#allocation5 + $0x20] sm:$0xff]  ;;  %v148_v11 = vld [vmem:[#allocation5 + $0x30] sm:$0xff]  ;;  %s1561_s30 = scalar_lea.vmem %s1021_s3, 256  ;;  %p1566_p1 = scmp.lt.s32.totalorder %s1021_s3, %s1021_s3 }
  0x80   :  { %v1078_v9 = vpack.c.bf16 %v149_v7, %v147_v6  ;;  %v151_v12 = vld [vmem:[#allocation5 + $0x48] sm:$0xff]  ;;  %1075 = vmatprep.subr.bf16.mxu0 %v1074_v4  ;;  %v153_v13 = vld [vmem:[#allocation5 + $0x58] sm:$0xff]  ;;  %v1080_v14 = vpack.c.bf16 %v148_v11, %v146_v10  ;;  %v150_v16 = vld [vmem:[#allocation5 + $0x40] sm:$0xff]  ;;  %p1562_p0 = scmp.ne.s32.totalorder %s1021_s3, %s1561_s30  ;;  %p1567_p2 = scmp.lt.s32.totalorder %s1561_s30, %s1561_s30 }
  0x81   :  { %1077 = vmatpush1.bf16.msra.mxu0 %v1076_v8  ;;  %v1082_v15 = vpack.c.bf16 %v153_v13, %v151_v12  ;;  %v152_v17 = vld [vmem:[#allocation5 + $0x50] sm:$0xff]  ;;  %v155_v18 = vld [vmem:[#allocation5 + $0x68] sm:$0xff]  ;;  %v157_v19 = vld [vmem:[#allocation5 + $0x78] sm:$0xff] }
  0x82   :  { %1079 = vmatprep.subr.bf16.mxu0 %v1078_v9  ;;  %v1084_v20 = vpack.c.bf16 %v152_v17, %v150_v16  ;;  %v1086_v21 = vpack.c.bf16 %v157_v19, %v155_v18  ;;  %v154_v22 = vld [vmem:[#allocation5 + $0x60] sm:$0xff]  ;;  %v156_v23 = vld [vmem:[#allocation5 + $0x70] sm:$0xff]  ;;  %v159_v24 = vld [vmem:[#allocation5 + $0x88] sm:$0xff]  ;;  %p1568_p3 = por %p1567_p2, %p1566_p1 }
  0x83   :  { %v161_v25 = vld [vmem:[#allocation5 + $0x98] sm:$0xff]  ;;  %v158_v26 = vld [vmem:[#allocation5 + $0x80] sm:$0xff]  ;;  %v160_v27 = vld [vmem:[#allocation5 + $0x90] sm:$0xff]  ;;  %v1088_v30 = vpack.c.bf16 %v156_v23, %v154_v22 }
  0x84   :  { %v264_v28 = vld [vmem:[#allocation7 + $0x8] sm:$0xff]  ;;  %v266_v29 = vld [vmem:[#allocation7 + $0x18] sm:$0xff]  ;;  %v263_v33 = vld [vmem:[#allocation7] sm:$0xff]  ;;  %v1090_v36 = vpack.c.bf16 %v161_v25, %v159_v24  ;;  %v1092_v46 = vpack.c.bf16 %v160_v27, %v158_v26  ;;  %p1569_p4 = pnand %p1568_p3, %p1562_p0 }
  0x85   :  { %1081 = vmatpush1.bf16.msra.mxu0 %v1080_v14  ;;  %v163_v31 = vld [vmem:[#allocation5 + $0xa8] sm:$0xff]  ;;  %v1106_v32 = vpack.c.bf16 %v266_v29, %v264_v28  ;;  %v265_v34 = vld [vmem:[#allocation7 + $0x10] sm:$0xff]  ;;  %v270_v38 = vld [vmem:[#allocation7 + $0x38] sm:$0xff] }
  0x86   :  { %1083 = vmatprep.subr.bf16.mxu0 %v1082_v15  ;;  %v268_v35 = vld [vmem:[#allocation7 + $0x28] sm:$0xff]  ;;  %v1108_v37 = vpack.c.bf16 %v265_v34, %v263_v33  ;;  %v267_v39 = vld [vmem:[#allocation7 + $0x20] sm:$0xff]  ;;  %v269_v40 = vld [vmem:[#allocation7 + $0x30] sm:$0xff] }
  0x87   :  { %v165_v41 = vld [vmem:[#allocation5 + $0xb8] sm:$0xff]  ;;  %1107 = vmatprep.subr.bf16.mxu1 %v1106_v32  ;;  %v1110_v42 = vpack.c.bf16 %v270_v38, %v268_v35  ;;  %v272_v43 = vld [vmem:[#allocation7 + $0x48] sm:$0xff]  ;;  %v1112_v45 = vpack.c.bf16 %v269_v40, %v267_v39  ;;  %v162_v47 = vld [vmem:[#allocation5 + $0xa0] sm:$0xff] }
  0x88   :  { %v274_v44 = vld [vmem:[#allocation7 + $0x58] sm:$0xff]  ;;  %1109 = vmatpush1.bf16.msra.mxu1 %v1108_v37  ;;  %v271_v49 = vld [vmem:[#allocation7 + $0x40] sm:$0xff]  ;;  %v273_v50 = vld [vmem:[#allocation7 + $0x50] sm:$0xff]  ;;  %v1094_v51 = vpack.c.bf16 %v165_v41, %v163_v31 }
  0x89   :  { %1085 = vmatpush1.bf16.msra.mxu0 %v1084_v20  ;;  %1111 = vmatprep.subr.bf16.mxu1 %v1110_v42  ;;  %v1114_v48 = vpack.c.bf16 %v274_v44, %v272_v43  ;;  %v164_v52 = vld [vmem:[#allocation5 + $0xb0] sm:$0xff]  ;;  %v276_v53 = vld [vmem:[#allocation7 + $0x68] sm:$0xff]  ;;  %v278_v54 = vld [vmem:[#allocation7 + $0x78] sm:$0xff]  ;;  %v1116_v57 = vpack.c.bf16 %v273_v50, %v271_v49 }
  0x8a   :  { %1087 = vmatprep.subr.bf16.mxu0 %v1086_v21  ;;  %v167_v55 = vld [vmem:[#allocation5 + $0xc8] sm:$0xff]  ;;  %v169_v56 = vld [vmem:[#allocation5 + $0xd8] sm:$0xff]  ;;  %v1096_v58 = vpack.c.bf16 %v164_v52, %v162_v47  ;;  %v166_v59 = vld [vmem:[#allocation5 + $0xc0] sm:$0xff]  ;;  %v1118_v60 = vpack.c.bf16 %v278_v54, %v276_v53 }
  0x8b   :  { %v275_v61 = vld [vmem:[#allocation7 + $0x60] sm:$0xff]  ;;  %v277_v62 = vld [vmem:[#allocation7 + $0x70] sm:$0xff]  ;;  %v1098_v63 = vpack.c.bf16 %v169_v56, %v167_v55  ;;  %v280_v2 = vld [vmem:[#allocation7 + $0x88] sm:$0xff] }
  0x8c   :  { %1113 = vmatpush1.bf16.msra.mxu1 %v1112_v45  ;;  %v168_v1 = vld [vmem:[#allocation5 + $0xd0] sm:$0xff]  ;;  %v282_v3 = vld [vmem:[#allocation7 + $0x98] sm:$0xff]  ;;  %v171_v4 = vld [vmem:[#allocation5 + $0xe8] sm:$0xff]  ;;  %v1120_v6 = vpack.c.bf16 %v277_v62, %v275_v61 }
  0x8d   :  { %1089 = vmatpush1.bf16.msra.mxu0 %v1088_v30  ;;  %1115 = vmatprep.subr.bf16.mxu1 %v1114_v48  ;;  %v173_v5 = vld [vmem:[#allocation5 + $0xf8] sm:$0xff]  ;;  %v1100_v7 = vpack.c.bf16 %v168_v1, %v166_v59  ;;  %v170_v8 = vld [vmem:[#allocation5 + $0xe0] sm:$0xff]  ;;  %v1122_v9 = vpack.c.bf16 %v282_v3, %v280_v2  ;;  %v281_v11 = vld [vmem:[#allocation7 + $0x90] sm:$0xff] }
  0x8e   :  { %1091 = vmatprep.subr.bf16.mxu0 %v1090_v36  ;;  %v279_v10 = vld [vmem:[#allocation7 + $0x80] sm:$0xff]  ;;  %v1102_v12 = vpack.c.bf16 %v173_v5, %v171_v4  ;;  %v172_v13 = vld [vmem:[#allocation5 + $0xf0] sm:$0xff]  ;;  %v284_v14 = vld [vmem:[#allocation7 + $0xa8] sm:$0xff] }
  0x8f   :  { %v286_v15 = vld [vmem:[#allocation7 + $0xb8] sm:$0xff]  ;;  %v1124_v16 = vpack.c.bf16 %v281_v11, %v279_v10  ;;  %v1104_v17 = vpack.c.bf16 %v172_v13, %v170_v8  ;;  %v283_v19 = vld [vmem:[#allocation7 + $0xa0] sm:$0xff]  ;;  %v285_v20 = vld [vmem:[#allocation7 + $0xb0] sm:$0xff] }
  0x90   :  { %1117 = vmatpush1.bf16.msra.mxu1 %v1116_v57  ;;  %v1126_v18 = vpack.c.bf16 %v286_v15, %v284_v14  ;;  %v288_v21 = vld [vmem:[#allocation7 + $0xc8] sm:$0xff]  ;;  %v290_v22 = vld [vmem:[#allocation7 + $0xd8] sm:$0xff]  ;;  %v1128_v23 = vpack.c.bf16 %v285_v20, %v283_v19  ;;  %v140_v24 = vld [vmem:[#allocation2] sm:$0xff] }
  0x91   :  { %1093 = vmatpush1.bf16.msra.mxu0 %v1092_v46  ;;  %1119 = vmatprep.subr.bf16.mxu1 %v1118_v60  ;;  %v1130_v25 = vpack.c.bf16 %v290_v22, %v288_v21  ;;  %v287_v26 = vld [vmem:[#allocation7 + $0xc0] sm:$0xff]  ;;  %v289_v27 = vld [vmem:[#allocation7 + $0xd0] sm:$0xff]  ;;  %v292_v28 = vld [vmem:[#allocation7 + $0xe8] sm:$0xff] }
  0x92   :  { %1095 = vmatprep.subr.bf16.mxu0 %v1094_v51  ;;  %v294_v29 = vld [vmem:[#allocation7 + $0xf8] sm:$0xff]  ;;  %v1132_v30 = vpack.c.bf16 %v289_v27, %v287_v26  ;;  %v291_v33 = vld [vmem:[#allocation7 + $0xe0] sm:$0xff]  ;;  %v293_v34 = vld [vmem:[#allocation7 + $0xf0] sm:$0xff] }
  0x93   :  { %v141_v31 = vld [vmem:[#allocation2 + $0x8] sm:$0xff]  ;;  %v1134_v32 = vpack.c.bf16 %v294_v29, %v292_v28  ;;  %v296_v35 = vld [vmem:[#allocation7 + $0x108] sm:$0xff]  ;;  %v1136_v37 = vpack.c.bf16 %v293_v34, %v291_v33  ;;  %v295_v39 = vld [vmem:[#allocation7 + $0x100] sm:$0xff] }
  0x94   :  { %1121 = vmatpush1.bf16.msra.mxu1 %v1120_v6  ;;  %v298_v36 = vld [vmem:[#allocation7 + $0x118] sm:$0xff]  ;;  %v297_v40 = vld [vmem:[#allocation7 + $0x110] sm:$0xff]  ;;  %v300_v41 = vld [vmem:[#allocation7 + $0x128] sm:$0xff] }
  0x95   :  { %1097 = vmatpush1.bf16.msra.mxu0 %v1096_v58  ;;  %1123 = vmatprep.subr.bf16.mxu1 %v1122_v9  ;;  %v1138_v38 = vpack.c.bf16 %v298_v36, %v296_v35  ;;  %v302_v42 = vld [vmem:[#allocation7 + $0x138] sm:$0xff]  ;;  %v1140_v43 = vpack.c.bf16 %v297_v40, %v295_v39  ;;  %v299_v44 = vld [vmem:[#allocation7 + $0x120] sm:$0xff]  ;;  %v301_v45 = vld [vmem:[#allocation7 + $0x130] sm:$0xff] }
  0x96   :  { %1099 = vmatprep.subr.bf16.mxu0 %v1098_v63  ;;  %v304_v46 = vld [vmem:[#allocation7 + $0x148] sm:$0xff]  ;;  %v306_v47 = vld [vmem:[#allocation7 + $0x158] sm:$0xff]  ;;  %v1144_v48 = vpack.c.bf16 %v301_v45, %v299_v44  ;;  %v303_v50 = vld [vmem:[#allocation7 + $0x140] sm:$0xff] }
  0x97   :  { %v1146_v49 = vpack.c.bf16 %v306_v47, %v304_v46  ;;  %v305_v51 = vld [vmem:[#allocation7 + $0x150] sm:$0xff]  ;;  %v308_v52 = vld [vmem:[#allocation7 + $0x168] sm:$0xff]  ;;  %v310_v53 = vld [vmem:[#allocation7 + $0x178] sm:$0xff] }
  0x98   :  { %1125 = vmatpush1.bf16.msra.mxu1 %v1124_v16  ;;  %v1148_v54 = vpack.c.bf16 %v305_v51, %v303_v50  ;;  %v1150_v55 = vpack.c.bf16 %v310_v53, %v308_v52  ;;  %v307_v56 = vld [vmem:[#allocation7 + $0x160] sm:$0xff]  ;;  %v309_v57 = vld [vmem:[#allocation7 + $0x170] sm:$0xff]  ;;  %v312_v58 = vld [vmem:[#allocation7 + $0x188] sm:$0xff] }
  0x99   :  { %1101 = vmatpush1.bf16.msra.mxu0 %v1100_v7  ;;  %1127 = vmatprep.subr.bf16.mxu1 %v1126_v18  ;;  %v314_v59 = vld [vmem:[#allocation7 + $0x198] sm:$0xff]  ;;  %v1152_v60 = vpack.c.bf16 %v309_v57, %v307_v56  ;;  %v311_v62 = vld [vmem:[#allocation7 + $0x180] sm:$0xff]  ;;  %v313_v63 = vld [vmem:[#allocation7 + $0x190] sm:$0xff] }
  0x9a   :  { %1103 = vmatprep.subr.bf16.mxu0 %v1102_v12  ;;  %v1154_v61 = vpack.c.bf16 %v314_v59, %v312_v58  ;;  %v316_v1 = vld [vmem:[#allocation7 + $0x1a8] sm:$0xff]  ;;  %v318_v2 = vld [vmem:[#allocation7 + $0x1b8] sm:$0xff]  ;;  %v1156_v3 = vpack.c.bf16 %v313_v63, %v311_v62  ;;  %v315_v5 = vld [vmem:[#allocation7 + $0x1a0] sm:$0xff] }
  0x9b   :  { %v1158_v4 = vpack.c.bf16 %v318_v2, %v316_v1  ;;  %v317_v6 = vld [vmem:[#allocation7 + $0x1b0] sm:$0xff]  ;;  %v320_v7 = vld [vmem:[#allocation7 + $0x1c8] sm:$0xff]  ;;  %v322_v8 = vld [vmem:[#allocation7 + $0x1d8] sm:$0xff] }
  0x9c   :  { %1129 = vmatpush1.bf16.msra.mxu1 %v1128_v23  ;;  %v1160_v9 = vpack.c.bf16 %v317_v6, %v315_v5  ;;  %v1162_v10 = vpack.c.bf16 %v322_v8, %v320_v7  ;;  %v319_v11 = vld [vmem:[#allocation7 + $0x1c0] sm:$0xff]  ;;  %v321_v12 = vld [vmem:[#allocation7 + $0x1d0] sm:$0xff]  ;;  %v324_v14 = vld [vmem:[#allocation7 + $0x1e8] sm:$0xff] }
  0x9d   :  { %1105 = vmatpush1.bf16.msra.mxu0 %v1104_v17  ;;  %1131 = vmatprep.subr.bf16.mxu1 %v1130_v25  ;;  %v1164_v13 = vpack.c.bf16 %v321_v12, %v319_v11  ;;  %v326_v15 = vld [vmem:[#allocation7 + $0x1f8] sm:$0xff]  ;;  %v323_v17 = vld [vmem:[#allocation7 + $0x1e0] sm:$0xff]  ;;  %v325_v18 = vld [vmem:[#allocation7 + $0x1f0] sm:$0xff] }
  0x9e   :  { %v1166_v16 = vpack.c.bf16 %v326_v15, %v324_v14  ;;  %v1168_v19 = vpack.c.bf16 %v325_v18, %v323_v17  ;;  %v421_v20 = vld [vmem:[#allocation8 + $0x8] sm:$0xff]  ;;  %v423_v21 = vld [vmem:[#allocation8 + $0x18] sm:$0xff]  ;;  %v420_v22 = vld [vmem:[#allocation8] sm:$0xff] }
  0x9f   :  { %v1170_v23 = vpack.c.bf16 %v423_v21, %v421_v20  ;;  %v425_v25 = vld [vmem:[#allocation8 + $0x28] sm:$0xff]  ;;  %v427_v26 = vld [vmem:[#allocation8 + $0x38] sm:$0xff]  ;;  %v424_v29 = vld [vmem:[#allocation8 + $0x20] sm:$0xff] }
  0xa0   :  { %251 = vmatmul.mubr.f32.vlgmr.msra.gmra.mrb[0].mxu0 %v140_v24  ;;  %1133 = vmatpush1.bf16.msra.mxu1 %v1132_v30  ;;  %v422_v24 = vld [vmem:[#allocation8 + $0x10] sm:$0xff]  ;;  %v1174_v28 = vpack.c.bf16 %v427_v26, %v425_v25  ;;  %v428_v35 = vld [vmem:[#allocation8 + $0x40] sm:$0xff]  ;;  %v461_v15 = vld [vmem:[#allocation8 + $0x148] sm:$0xff] }
  0xa1   :  { %256 = vmatprep.mubr.f32.mxu0 %v1604_v0  ;;  %1135 = vmatprep.subr.bf16.mxu1 %v1134_v32  ;;  %v1142_v0 = vpack.c.bf16 %v302_v42, %v300_v41  ;;  %v1172_v27 = vpack.c.bf16 %v422_v24, %v420_v22  ;;  %v426_v30 = vld [vmem:[#allocation8 + $0x30] sm:$0xff]  ;;  %v431_v32 = vld [vmem:[#allocation8 + $0x58] sm:$0xff]  ;;  %v432_v41 = vld [vmem:[#allocation8 + $0x60] sm:$0xff] }
  0xa2   :  { %1171 = vmatprep.subr.bf16.mxu0 %v1170_v23  ;;  %v1176_v33 = vpack.c.bf16 %v426_v30, %v424_v29  ;;  %v430_v36 = vld [vmem:[#allocation8 + $0x50] sm:$0xff]  ;;  %v436_v46 = vld [vmem:[#allocation8 + $0x80] sm:$0xff]  ;;  %v465_v21 = vld [vmem:[#allocation8 + $0x168] sm:$0xff] }
  0xa3   :  { %1173 = vmatpush1.bf16.msra.mxu0 %v1172_v27  ;;  %v1180_v39 = vpack.c.bf16 %v430_v36, %v428_v35  ;;  %v434_v42 = vld [vmem:[#allocation8 + $0x70] sm:$0xff]  ;;  %v440_v52 = vld [vmem:[#allocation8 + $0xa0] sm:$0xff]  ;;  %v467_v22 = vld [vmem:[#allocation8 + $0x178] sm:$0xff] }
  0xa4   :  { %257 = vmatmul.mubr.f32.gmra.mrb[2].mxu0 %v141_v31  ;;  %1137 = vmatpush1.bf16.msra.mxu1 %v1136_v37  ;;  %v429_v31 = vld [vmem:[#allocation8 + $0x48] sm:$0xff]  ;;  %v1184_v44 = vpack.c.bf16 %v434_v42, %v432_v41  ;;  %v438_v47 = vld [vmem:[#allocation8 + $0x90] sm:$0xff]  ;;  %v444_v58 = vld [vmem:[#allocation8 + $0xc0] sm:$0xff]  ;;  %v1214_v24 = vpack.c.bf16 %v467_v22, %v465_v21 }
  0xa5   :  { %1139 = vmatprep.subr.bf16.mxu1 %v1138_v38  ;;  %1175 = vmatprep.subr.bf16.mxu0 %v1174_v28  ;;  %v1178_v34 = vpack.c.bf16 %v431_v32, %v429_v31  ;;  %v433_v37 = vld [vmem:[#allocation8 + $0x68] sm:$0xff]  ;;  %v435_v38 = vld [vmem:[#allocation8 + $0x78] sm:$0xff]  ;;  %v1188_v50 = vpack.c.bf16 %v438_v47, %v436_v46  ;;  %v442_v53 = vld [vmem:[#allocation8 + $0xb0] sm:$0xff] }
  0xa6   :  { %v1182_v40 = vpack.c.bf16 %v435_v38, %v433_v37  ;;  %v1192_v56 = vpack.c.bf16 %v442_v53, %v440_v52  ;;  %v446_v59 = vld [vmem:[#allocation8 + $0xd0] sm:$0xff]  ;;  %v448_v1 = vld [vmem:[#allocation8 + $0xe0] sm:$0xff]  ;;  %v469_v27 = vld [vmem:[#allocation8 + $0x188] sm:$0xff] }
  0xa7   :  { %1177 = vmatpush1.bf16.msra.mxu0 %v1176_v33  ;;  %v1196_v62 = vpack.c.bf16 %v446_v59, %v444_v58  ;;  %v450_v2 = vld [vmem:[#allocation8 + $0xf0] sm:$0xff]  ;;  %v452_v7 = vld [vmem:[#allocation8 + $0x100] sm:$0xff]  ;;  %v471_v28 = vld [vmem:[#allocation8 + $0x198] sm:$0xff] }
  0xa8   :  { %1141 = vmatpush1.bf16.msra.mxu1 %v1140_v43  ;;  %1179 = vmatprep.subr.bf16.mxu0 %v1178_v34  ;;  %v437_v43 = vld [vmem:[#allocation8 + $0x88] sm:$0xff]  ;;  %v1200_v5 = vpack.c.bf16 %v450_v2, %v448_v1  ;;  %v454_v8 = vld [vmem:[#allocation8 + $0x110] sm:$0xff]  ;;  %v464_v25 = vld [vmem:[#allocation8 + $0x160] sm:$0xff]  ;;  %v1218_v30 = vpack.c.bf16 %v471_v28, %v469_v27 }
  0xa9   :  { %1143 = vmatprep.subr.bf16.mxu1 %v1142_v0  ;;  %v439_v0 = vld [vmem:[#allocation8 + $0x98] sm:$0xff]  ;;  %v1204_v11 = vpack.c.bf16 %v454_v8, %v452_v7  ;;  %v458_v14 = vld [vmem:[#allocation8 + $0x130] sm:$0xff]  ;;  %v468_v31 = vld [vmem:[#allocation8 + $0x180] sm:$0xff] }
  0xaa   :  { %v1186_v45 = vpack.c.bf16 %v439_v0, %v437_v43  ;;  %v462_v20 = vld [vmem:[#allocation8 + $0x150] sm:$0xff]  ;;  %v473_v33 = vld [vmem:[#allocation8 + $0x1a8] sm:$0xff]  ;;  %v475_v34 = vld [vmem:[#allocation8 + $0x1b8] sm:$0xff]  ;;  %v176_v43 = vlaneseq }
  0xab   :  { %1181 = vmatpush1.bf16.msra.mxu0 %v1180_v39  ;;  %v466_v26 = vld [vmem:[#allocation8 + $0x170] sm:$0xff]  ;;  %v1222_v36 = vpack.c.bf16 %v475_v34, %v473_v33  ;;  %v472_v37 = vld [vmem:[#allocation8 + $0x1a0] sm:$0xff]  ;;  %v477_v39 = vld [vmem:[#allocation8 + $0x1c8] sm:$0xff] }
  0xac   :  { %1145 = vmatpush1.bf16.msra.mxu1 %v1144_v48  ;;  %1183 = vmatprep.subr.bf16.mxu0 %v1182_v40  ;;  %v441_v48 = vld [vmem:[#allocation8 + $0xa8] sm:$0xff]  ;;  %v1216_v29 = vpack.c.bf16 %v466_v26, %v464_v25  ;;  %v470_v32 = vld [vmem:[#allocation8 + $0x190] sm:$0xff]  ;;  %v479_v40 = vld [vmem:[#allocation8 + $0x1d8] sm:$0xff]  ;;  %v177_v0 = vshrl.u32 %v176_v43, 7 }
  0xad   :  { %1147 = vmatprep.subr.bf16.mxu1 %v1146_v49  ;;  %v443_v49 = vld [vmem:[#allocation8 + $0xb8] sm:$0xff]  ;;  %v1220_v35 = vpack.c.bf16 %v470_v32, %v468_v31  ;;  %v474_v38 = vld [vmem:[#allocation8 + $0x1b0] sm:$0xff]  ;;  %v1226_v42 = vpack.c.bf16 %v479_v40, %v477_v39  ;;  %v586_v8 = vld [vmem:[#allocation10 + $0x28] sm:$0xff] }
  0xae   :  { %v1190_v51 = vpack.c.bf16 %v443_v49, %v441_v48  ;;  %v1224_v41 = vpack.c.bf16 %v474_v38, %v472_v37  ;;  %v1795_v46 = vsub.s32 0, %v177_v0  ;;  %v478_v58 = vld [vmem:[#allocation8 + $0x1d0] sm:$0xff]  ;;  %v596_v21 = vld [vmem:[#allocation10 + $0x78] sm:$0xff]  ;;  %v598_v26 = vld [vmem:[#allocation10 + $0x88] sm:$0xff] }
  0xaf   :  { %1185 = vmatpush1.bf16.msra.mxu0 %v1184_v44  ;;  %v1790_v44 = vsub.s32 1, %v177_v0  ;;  %v482_v1 = vld [vmem:[#allocation8 + $0x1f0] sm:$0xff]  ;;  %v600_v27 = vld [vmem:[#allocation10 + $0x98] sm:$0xff]  ;;  %v602_v32 = vld [vmem:[#allocation10 + $0xa8] sm:$0xff] }
  0xb0   :  { %1149 = vmatpush1.bf16.msra.mxu1 %v1148_v54  ;;  %1187 = vmatprep.subr.bf16.mxu0 %v1186_v45  ;;  %v445_v54 = vld [vmem:[#allocation8 + $0xc8] sm:$0xff]  ;;  %v174_v45 = vld [vmem:[%s1883_s2] sm:$0x3]  ;;  %v604_v33 = vld [vmem:[#allocation10 + $0xb8] sm:$0xff] }
  0xb1   :  { %1151 = vmatprep.subr.bf16.mxu1 %v1150_v55  ;;  %v447_v55 = vld [vmem:[#allocation8 + $0xd8] sm:$0xff]  ;;  %v183_v47 = vrot.slane %v174_v45, %v1790_v44  ;;  %v179_v48 = vrot.slane %v174_v45, %v1795_v46  ;;  %v583_v7 = vld [vmem:[#allocation10 + $0x10] sm:$0xff]  ;;  %v606_v38 = vld [vmem:[#allocation10 + $0xc8] sm:$0xff] }
  0xb2   :  { %v1194_v57 = vpack.c.bf16 %v447_v55, %v445_v54  ;;  %v595_v25 = vld [vmem:[#allocation10 + $0x70] sm:$0xff]  ;;  %v608_v39 = vld [vmem:[#allocation10 + $0xd8] sm:$0xff]  ;;  %v610_v0 = vld [vmem:[#allocation10 + $0xe8] sm:$0xff] }
  0xb3   :  { %1189 = vmatpush1.bf16.msra.mxu0 %v1188_v50  ;;  %v599_v31 = vld [vmem:[#allocation10 + $0x90] sm:$0xff]  ;;  %v612_v45 = vld [vmem:[#allocation10 + $0xf8] sm:$0xff] }
  0xb4   :  { %1153 = vmatpush1.bf16.msra.mxu1 %v1152_v60  ;;  %1191 = vmatprep.subr.bf16.mxu0 %v1190_v51  ;;  %v449_v60 = vld [vmem:[#allocation8 + $0xe8] sm:$0xff]  ;;  %v603_v37 = vld [vmem:[#allocation10 + $0xb0] sm:$0xff] }
  0xb5   :  { %1155 = vmatprep.subr.bf16.mxu1 %v1154_v61  ;;  %v451_v61 = vld [vmem:[#allocation8 + $0xf8] sm:$0xff]  ;;  %v607_v43 = vld [vmem:[#allocation10 + $0xd0] sm:$0xff] }
  0xb6   :  { %v1198_v63 = vpack.c.bf16 %v451_v61, %v449_v60  ;;  %v481_v60 = vld [vmem:[#allocation8 + $0x1e8] sm:$0xff]  ;;  %v483_v61 = vld [vmem:[#allocation8 + $0x1f8] sm:$0xff] }
  0xb7   :  { %1193 = vmatpush1.bf16.msra.mxu0 %v1192_v56 }
  0xb8   :  { %1157 = vmatpush1.bf16.msra.mxu1 %v1156_v3  ;;  %1195 = vmatprep.subr.bf16.mxu0 %v1194_v57  ;;  %v453_v3 = vld [vmem:[#allocation8 + $0x108] sm:$0xff]  ;;  %v476_v57 = vld [vmem:[#allocation8 + $0x1c0] sm:$0xff] }
  0xb9   :  { %1159 = vmatprep.subr.bf16.mxu1 %v1158_v4  ;;  %v455_v4 = vld [vmem:[#allocation8 + $0x118] sm:$0xff]  ;;  %v1228_v59 = vpack.c.bf16 %v478_v58, %v476_v57 }
  0xba   :  { %v1202_v6 = vpack.c.bf16 %v455_v4, %v453_v3  ;;  %v582_v3 = vld [vmem:[#allocation10 + $0x8] sm:$0xff]  ;;  %v584_v4 = vld [vmem:[#allocation10 + $0x18] sm:$0xff] }
  0xbb   :  { %1197 = vmatpush1.bf16.msra.mxu0 %v1196_v62  ;;  %v1230_v62 = vpack.c.bf16 %v483_v61, %v481_v60  ;;  %v615_v60 = vld [vmem:[#allocation10 + $0x110] sm:$0xff]  ;;  %v618_v61 = vld [vmem:[#allocation10 + $0x128] sm:$0xff] }
  0xbc   :  { %1161 = vmatpush1.bf16.msra.mxu1 %v1160_v9  ;;  %1199 = vmatprep.subr.bf16.mxu0 %v1198_v63  ;;  %v457_v9 = vld [vmem:[#allocation8 + $0x128] sm:$0xff]  ;;  %v480_v63 = vld [vmem:[#allocation8 + $0x1e0] sm:$0xff] }
  0xbd   :  { %1163 = vmatprep.subr.bf16.mxu1 %v1162_v10  ;;  %v459_v10 = vld [vmem:[#allocation8 + $0x138] sm:$0xff]  ;;  %v1232_v2 = vpack.c.bf16 %v482_v1, %v480_v63 }
  0xbe   :  { %v1206_v12 = vpack.c.bf16 %v459_v10, %v457_v9  ;;  %v588_v9 = vld [vmem:[#allocation10 + $0x38] sm:$0xff] }
  0xbf   :  { %1201 = vmatpush1.bf16.msra.mxu0 %v1200_v5  ;;  %v581_v5 = vld [vmem:[#allocation10] sm:$0xff] }
  0xc0   :  { %1165 = vmatpush1.bf16.msra.mxu1 %v1164_v13  ;;  %1203 = vmatprep.subr.bf16.mxu0 %v1202_v6  ;;  %v456_v13 = vld [vmem:[#allocation8 + $0x120] sm:$0xff]  ;;  %v1234_v6 = vpack.c.bf16 %v584_v4, %v582_v3  ;;  %v1236_v10 = vpack.c.bf16 %v583_v7, %v581_v5  ;;  %v619_v3 = vld [vmem:[#allocation10 + $0x130] sm:$0xff]  ;;  %v622_v4 = vld [vmem:[#allocation10 + $0x148] sm:$0xff] }
  0xc1   :  { %1167 = vmatprep.subr.bf16.mxu1 %v1166_v16  ;;  %v463_v16 = vld [vmem:[#allocation8 + $0x158] sm:$0xff]  ;;  %v1208_v17 = vpack.c.bf16 %v458_v14, %v456_v13  ;;  %v587_v13 = vld [vmem:[#allocation10 + $0x30] sm:$0xff]  ;;  %v590_v14 = vld [vmem:[#allocation10 + $0x48] sm:$0xff] }
  0xc2   :  { %v1210_v18 = vpack.c.bf16 %v463_v16, %v461_v15  ;;  %v592_v15 = vld [vmem:[#allocation10 + $0x58] sm:$0xff] }
  0xc3   :  { %1205 = vmatpush1.bf16.msra.mxu0 %v1204_v11  ;;  %v1238_v11 = vpack.c.bf16 %v588_v9, %v586_v8  ;;  %v624_v5 = vld [vmem:[#allocation10 + $0x158] sm:$0xff]  ;;  %v621_v8 = vld [vmem:[#allocation10 + $0x140] sm:$0xff]  ;;  %v623_v9 = vld [vmem:[#allocation10 + $0x150] sm:$0xff] }
  0xc4   :  { %1169 = vmatpush1.bf16.msra.mxu1 %v1168_v19  ;;  %1207 = vmatprep.subr.bf16.mxu0 %v1206_v12  ;;  %v460_v19 = vld [vmem:[#allocation8 + $0x140] sm:$0xff]  ;;  %v1274_v7 = vpack.c.bf16 %v624_v5, %v622_v4  ;;  %v745_v4 = vld [vmem:[#allocation11 + $0x38] sm:$0xff] }
  0xc5   :  { %v1212_v23 = vpack.c.bf16 %v462_v20, %v460_v19  ;;  %v585_v12 = vld [vmem:[#allocation10 + $0x20] sm:$0xff]  ;;  %1235 = vmatprep.subr.bf16.mxu1 %v1234_v6  ;;  %v591_v19 = vld [vmem:[#allocation10 + $0x50] sm:$0xff]  ;;  %v594_v20 = vld [vmem:[#allocation10 + $0x68] sm:$0xff] }
  0xc6   :  { %v1240_v16 = vpack.c.bf16 %v587_v13, %v585_v12  ;;  %v1276_v12 = vpack.c.bf16 %v623_v9, %v621_v8  ;;  %v744_v8 = vld [vmem:[#allocation11 + $0x30] sm:$0xff]  ;;  %v747_v9 = vld [vmem:[#allocation11 + $0x48] sm:$0xff] }
  0xc7   :  { %1209 = vmatpush1.bf16.msra.mxu0 %v1208_v17  ;;  %v1242_v17 = vpack.c.bf16 %v592_v15, %v590_v14  ;;  %v625_v14 = vld [vmem:[#allocation10 + $0x160] sm:$0xff]  ;;  %v627_v15 = vld [vmem:[#allocation10 + $0x170] sm:$0xff] }
  0xc8   :  { %1211 = vmatprep.subr.bf16.mxu0 %v1210_v18  ;;  %v589_v18 = vld [vmem:[#allocation10 + $0x40] sm:$0xff] }
  0xc9   :  { %v1244_v22 = vpack.c.bf16 %v591_v19, %v589_v18  ;;  %v1280_v18 = vpack.c.bf16 %v627_v15, %v625_v14  ;;  %v748_v14 = vld [vmem:[#allocation11 + $0x50] sm:$0xff]  ;;  %v751_v15 = vld [vmem:[#allocation11 + $0x68] sm:$0xff] }
  0xcb   :  { %1213 = vmatpush1.bf16.msra.mxu0 %v1212_v23  ;;  %v1246_v23 = vpack.c.bf16 %v596_v21, %v594_v20  ;;  %v629_v20 = vld [vmem:[#allocation10 + $0x180] sm:$0xff]  ;;  %v631_v21 = vld [vmem:[#allocation10 + $0x190] sm:$0xff] }
  0xcc   :  { %1215 = vmatprep.subr.bf16.mxu0 %v1214_v24  ;;  %v593_v24 = vld [vmem:[#allocation10 + $0x60] sm:$0xff] }
  0xcd   :  { %v1248_v28 = vpack.c.bf16 %v595_v25, %v593_v24  ;;  %v1284_v24 = vpack.c.bf16 %v631_v21, %v629_v20  ;;  %v752_v20 = vld [vmem:[#allocation11 + $0x70] sm:$0xff]  ;;  %v755_v21 = vld [vmem:[#allocation11 + $0x88] sm:$0xff] }
  0xcf   :  { %1217 = vmatpush1.bf16.msra.mxu0 %v1216_v29  ;;  %v1250_v29 = vpack.c.bf16 %v600_v27, %v598_v26  ;;  %v633_v26 = vld [vmem:[#allocation10 + $0x1a0] sm:$0xff]  ;;  %v635_v27 = vld [vmem:[#allocation10 + $0x1b0] sm:$0xff] }
  0xd0   :  { %1219 = vmatprep.subr.bf16.mxu0 %v1218_v30  ;;  %v597_v30 = vld [vmem:[#allocation10 + $0x80] sm:$0xff] }
  0xd1   :  { %v1252_v34 = vpack.c.bf16 %v599_v31, %v597_v30 }
  0xd3   :  { %1221 = vmatpush1.bf16.msra.mxu0 %v1220_v35  ;;  %v1254_v35 = vpack.c.bf16 %v604_v33, %v602_v32 }
  0xd4   :  { %1223 = vmatprep.subr.bf16.mxu0 %v1222_v36  ;;  %v601_v36 = vld [vmem:[#allocation10 + $0xa0] sm:$0xff] }
  0xd5   :  { %v1256_v40 = vpack.c.bf16 %v603_v37, %v601_v36 }
  0xd7   :  { %1225 = vmatpush1.bf16.msra.mxu0 %v1224_v41  ;;  %v1258_v41 = vpack.c.bf16 %v608_v39, %v606_v38 }
  0xd8   :  { %1227 = vmatprep.subr.bf16.mxu0 %v1226_v42  ;;  %v605_v42 = vld [vmem:[#allocation10 + $0xc0] sm:$0xff] }
  0xdb   :  { %1229 = vmatpush1.bf16.msra.mxu0 %v1228_v59  ;;  %v613_v59 = vld [vmem:[#allocation10 + $0x100] sm:$0xff] }
  0xdc   :  { %1231 = vmatprep.subr.bf16.mxu0 %v1230_v62  ;;  %v620_v62 = vld [vmem:[#allocation10 + $0x138] sm:$0xff]  ;;  %v1268_v63 = vpack.c.bf16 %v615_v60, %v613_v59  ;;  %v643_v59 = vld [vmem:[#allocation10 + $0x1f0] sm:$0xff] }
  0xdd   :  { %v1270_v1 = vpack.c.bf16 %v620_v62, %v618_v61  ;;  %v739_v61 = vld [vmem:[#allocation11 + $0x8] sm:$0xff]  ;;  %v741_v62 = vld [vmem:[#allocation11 + $0x18] sm:$0xff] }
  0xdf   :  { %1233 = vmatpush1.bf16.msra.mxu0 %v1232_v2  ;;  %v617_v2 = vld [vmem:[#allocation10 + $0x120] sm:$0xff] }
  0xe0   :  { %v1272_v6 = vpack.c.bf16 %v619_v3, %v617_v2  ;;  %v740_v2 = vld [vmem:[#allocation11 + $0x10] sm:$0xff]  ;;  %v743_v3 = vld [vmem:[#allocation11 + $0x28] sm:$0xff] }
 0x173   :  { %v252_v49 = vpop.f32.mrb[0].mxu0 }
 0x174   :  { %v254_v50 = vpop.f32.mrb[1].mxu0  ;;  %v1801_v52 = vadd.f32 %v252_v49, %v179_v48  ;;  %v609_v49 = vld [vmem:[#allocation10 + $0xe0] sm:$0xff] }
 0x175   :  { %v1799_v51 = vadd.f32 %v254_v50, %v183_v47  ;;  %v611_v50 = vld [vmem:[#allocation10 + $0xf0] sm:$0xff] }
 0x176   :  { %v1264_v57 = vpack.c.bf16 %v611_v50, %v609_v49  ;;  %v639_v49 = vld [vmem:[#allocation10 + $0x1d0] sm:$0xff] }
 0x177   :  { %v258_v53 = vpop.f32.mrb[2].mxu0  ;;  %403 = vmatprep.mubr.f32.mxu1 %v1799_v51 }
 0x178   :  { %v260_v54 = vpop.f32.mrb[3].mxu0  ;;  %404 = vmatmul.mubr.f32.vlgmr.msra.gmra.mrb[0].mxu1 %v1801_v52  ;;  %v1807_v56 = vadd.f32 %v258_v53, %v179_v48  ;;  %v1262_v48 = vpack.c.bf16 %v612_v45, %v610_v0  ;;  %v614_v53 = vld [vmem:[#allocation10 + $0x108] sm:$0xff]  ;;  %v640_v45 = vld [vmem:[#allocation10 + $0x1d8] sm:$0xff] }
 0x179   :  { %v1805_v55 = vadd.f32 %v260_v54, %v183_v47  ;;  %1237 = vmatpush1.bf16.msra.mxu1 %v1236_v10  ;;  %v1260_v47 = vpack.c.bf16 %v607_v43, %v605_v42  ;;  %v616_v54 = vld [vmem:[#allocation10 + $0x118] sm:$0xff]  ;;  %v626_v10 = vld [vmem:[#allocation10 + $0x168] sm:$0xff] }
 0x17a   :  { %1239 = vmatprep.subr.bf16.mxu1 %v1238_v11  ;;  %v1266_v58 = vpack.c.bf16 %v616_v54, %v614_v53  ;;  %v628_v11 = vld [vmem:[#allocation10 + $0x178] sm:$0xff]  ;;  %v638_v0 = vld [vmem:[#allocation10 + $0x1c8] sm:$0xff] }
 0x17b   :  { %409 = vmatprep.mubr.f32.mxu1 %v1805_v55  ;;  %v1278_v13 = vpack.c.bf16 %v628_v11, %v626_v10  ;;  %v642_v53 = vld [vmem:[#allocation10 + $0x1e8] sm:$0xff]  ;;  %v644_v54 = vld [vmem:[#allocation10 + $0x1f8] sm:$0xff] }
 0x17c   :  { %410 = vmatmul.mubr.f32.gmra.mrb[2].mxu1 %v1807_v56  ;;  %v749_v10 = vld [vmem:[#allocation11 + $0x58] sm:$0xff] }
 0x17d   :  { %1241 = vmatpush1.bf16.msra.mxu1 %v1240_v16  ;;  %v630_v16 = vld [vmem:[#allocation10 + $0x188] sm:$0xff] }
 0x17e   :  { %1243 = vmatprep.subr.bf16.mxu1 %v1242_v17  ;;  %v632_v17 = vld [vmem:[#allocation10 + $0x198] sm:$0xff] }
 0x17f   :  { %v1282_v19 = vpack.c.bf16 %v632_v17, %v630_v16  ;;  %v753_v16 = vld [vmem:[#allocation11 + $0x78] sm:$0xff] }
 0x181   :  { %1245 = vmatpush1.bf16.msra.mxu1 %v1244_v22  ;;  %v634_v22 = vld [vmem:[#allocation10 + $0x1a8] sm:$0xff] }
 0x182   :  { %1247 = vmatprep.subr.bf16.mxu1 %v1246_v23  ;;  %v636_v23 = vld [vmem:[#allocation10 + $0x1b8] sm:$0xff] }
 0x183   :  { %v1286_v25 = vpack.c.bf16 %v636_v23, %v634_v22  ;;  %v757_v22 = vld [vmem:[#allocation11 + $0x98] sm:$0xff] }
 0x185   :  { %1249 = vmatpush1.bf16.msra.mxu1 %v1248_v28  ;;  %v1288_v28 = vpack.c.bf16 %v635_v27, %v633_v26  ;;  %v756_v26 = vld [vmem:[#allocation11 + $0x90] sm:$0xff]  ;;  %v759_v27 = vld [vmem:[#allocation11 + $0xa8] sm:$0xff] }
 0x186   :  { %1251 = vmatprep.subr.bf16.mxu1 %v1250_v29  ;;  %v327_v29 = vld [vmem:[%s1885_s4] sm:$0x3] }
 0x187   :  { %v332_v30 = vrot.slane %v327_v29, %v1795_v46  ;;  %v336_v31 = vrot.slane %v327_v29, %v1790_v44 }
 0x189   :  { %1253 = vmatpush1.bf16.msra.mxu1 %v1252_v34 }
 0x18a   :  { %1255 = vmatprep.subr.bf16.mxu1 %v1254_v35 }
 0x18d   :  { %1257 = vmatpush1.bf16.msra.mxu1 %v1256_v40 }
 0x18e   :  { %1259 = vmatprep.subr.bf16.mxu1 %v1258_v41 }
 0x191   :  { %1261 = vmatpush1.bf16.msra.mxu1 %v1260_v47  ;;  %v1290_v47 = vpack.c.bf16 %v640_v45, %v638_v0  ;;  %v768_v0 = vld [vmem:[#allocation11 + $0xf0] sm:$0xff]  ;;  %v771_v45 = vld [vmem:[#allocation11 + $0x108] sm:$0xff] }
 0x192   :  { %1263 = vmatprep.subr.bf16.mxu1 %v1262_v48  ;;  %v637_v48 = vld [vmem:[#allocation10 + $0x1c0] sm:$0xff] }
 0x193   :  { %v1292_v50 = vpack.c.bf16 %v639_v49, %v637_v48 }
 0x195   :  { %1265 = vmatpush1.bf16.msra.mxu1 %v1264_v57  ;;  %v1294_v57 = vpack.c.bf16 %v644_v54, %v642_v53  ;;  %v772_v53 = vld [vmem:[#allocation11 + $0x110] sm:$0xff]  ;;  %v775_v54 = vld [vmem:[#allocation11 + $0x128] sm:$0xff] }
 0x196   :  { %1267 = vmatprep.subr.bf16.mxu1 %v1266_v58  ;;  %v641_v58 = vld [vmem:[#allocation10 + $0x1e0] sm:$0xff] }
 0x197   :  { %v1296_v60 = vpack.c.bf16 %v643_v59, %v641_v58 }
 0x199   :  { %1269 = vmatpush1.bf16.msra.mxu1 %v1268_v63  ;;  %v738_v63 = vld [vmem:[#allocation11] sm:$0xff] }
 0x19a   :  { %1271 = vmatprep.subr.bf16.mxu1 %v1270_v1  ;;  %v1298_v1 = vpack.c.bf16 %v741_v62, %v739_v61  ;;  %v1300_v5 = vpack.c.bf16 %v740_v2, %v738_v63  ;;  %v776_v61 = vld [vmem:[#allocation11 + $0x130] sm:$0xff]  ;;  %v779_v62 = vld [vmem:[#allocation11 + $0x148] sm:$0xff]  ;;  %v781_v63 = vld [vmem:[#allocation11 + $0x158] sm:$0xff] }
 0x19b   :  { %v1338_v2 = vpack.c.bf16 %v781_v63, %v779_v62  ;;  %v918_v62 = vld [vmem:[#allocation13 + $0x98] sm:$0xff] }
 0x19c   :  { %1299 = vmatprep.subr.bf16.mxu0 %v1298_v1 }
 0x19d   :  { %1273 = vmatpush1.bf16.msra.mxu1 %v1272_v6  ;;  %v1302_v6 = vpack.c.bf16 %v745_v4, %v743_v3  ;;  %v778_v3 = vld [vmem:[#allocation11 + $0x140] sm:$0xff]  ;;  %v780_v4 = vld [vmem:[#allocation11 + $0x150] sm:$0xff] }
 0x19e   :  { %1275 = vmatprep.subr.bf16.mxu1 %v1274_v7  ;;  %v742_v7 = vld [vmem:[#allocation11 + $0x20] sm:$0xff] }
 0x19f   :  { %v1304_v11 = vpack.c.bf16 %v744_v8, %v742_v7  ;;  %v1340_v7 = vpack.c.bf16 %v780_v4, %v778_v3  ;;  %v902_v3 = vld [vmem:[#allocation13 + $0x18] sm:$0xff]  ;;  %v919_v4 = vld [vmem:[#allocation13 + $0xa0] sm:$0xff] }
 0x1a1   :  { %1277 = vmatpush1.bf16.msra.mxu1 %v1276_v12  ;;  %v1306_v12 = vpack.c.bf16 %v749_v10, %v747_v9  ;;  %v782_v9 = vld [vmem:[#allocation11 + $0x160] sm:$0xff]  ;;  %v784_v10 = vld [vmem:[#allocation11 + $0x170] sm:$0xff] }
 0x1a2   :  { %1279 = vmatprep.subr.bf16.mxu1 %v1278_v13  ;;  %v746_v13 = vld [vmem:[#allocation11 + $0x40] sm:$0xff] }
 0x1a3   :  { %v1308_v17 = vpack.c.bf16 %v748_v14, %v746_v13  ;;  %v1344_v13 = vpack.c.bf16 %v784_v10, %v782_v9  ;;  %v904_v9 = vld [vmem:[#allocation13 + $0x28] sm:$0xff]  ;;  %v921_v10 = vld [vmem:[#allocation13 + $0xb0] sm:$0xff] }
 0x1a5   :  { %1281 = vmatpush1.bf16.msra.mxu1 %v1280_v18  ;;  %v1310_v18 = vpack.c.bf16 %v753_v16, %v751_v15  ;;  %v786_v15 = vld [vmem:[#allocation11 + $0x180] sm:$0xff]  ;;  %v788_v16 = vld [vmem:[#allocation11 + $0x190] sm:$0xff] }
 0x1a6   :  { %1283 = vmatprep.subr.bf16.mxu1 %v1282_v19  ;;  %v750_v19 = vld [vmem:[#allocation11 + $0x60] sm:$0xff] }
 0x1a7   :  { %v1312_v23 = vpack.c.bf16 %v752_v20, %v750_v19  ;;  %v1348_v19 = vpack.c.bf16 %v788_v16, %v786_v15  ;;  %v906_v15 = vld [vmem:[#allocation13 + $0x38] sm:$0xff]  ;;  %v923_v16 = vld [vmem:[#allocation13 + $0xc0] sm:$0xff] }
 0x1a9   :  { %1285 = vmatpush1.bf16.msra.mxu1 %v1284_v24  ;;  %v1314_v24 = vpack.c.bf16 %v757_v22, %v755_v21  ;;  %v790_v21 = vld [vmem:[#allocation11 + $0x1a0] sm:$0xff]  ;;  %v792_v22 = vld [vmem:[#allocation11 + $0x1b0] sm:$0xff] }
 0x1aa   :  { %1287 = vmatprep.subr.bf16.mxu1 %v1286_v25  ;;  %v754_v25 = vld [vmem:[#allocation11 + $0x80] sm:$0xff] }
 0x1ab   :  { %v1316_v29 = vpack.c.bf16 %v756_v26, %v754_v25  ;;  %v1352_v25 = vpack.c.bf16 %v792_v22, %v790_v21  ;;  %v908_v21 = vld [vmem:[#allocation13 + $0x48] sm:$0xff]  ;;  %v925_v22 = vld [vmem:[#allocation13 + $0xd0] sm:$0xff] }
 0x1ad   :  { %1289 = vmatpush1.bf16.msra.mxu1 %v1288_v28  ;;  %v761_v28 = vld [vmem:[#allocation11 + $0xb8] sm:$0xff] }
 0x1ae   :  { %1291 = vmatprep.subr.bf16.mxu1 %v1290_v47  ;;  %v773_v47 = vld [vmem:[#allocation11 + $0x118] sm:$0xff] }
 0x1af   :  { %v1330_v49 = vpack.c.bf16 %v773_v47, %v771_v45  ;;  %v799_v45 = vld [vmem:[#allocation11 + $0x1e8] sm:$0xff]  ;;  %v801_v47 = vld [vmem:[#allocation11 + $0x1f8] sm:$0xff] }
 0x1b1   :  { %1293 = vmatpush1.bf16.msra.mxu1 %v1292_v50  ;;  %v770_v50 = vld [vmem:[#allocation11 + $0x100] sm:$0xff] }
 0x1b2   :  { %1295 = vmatprep.subr.bf16.mxu1 %v1294_v57  ;;  %v777_v57 = vld [vmem:[#allocation11 + $0x138] sm:$0xff]  ;;  %v1332_v58 = vpack.c.bf16 %v772_v53, %v770_v50  ;;  %v800_v50 = vld [vmem:[#allocation11 + $0x1f0] sm:$0xff] }
 0x1b3   :  { %v1334_v59 = vpack.c.bf16 %v777_v57, %v775_v54  ;;  %v915_v54 = vld [vmem:[#allocation13 + $0x80] sm:$0xff]  ;;  %v916_v57 = vld [vmem:[#allocation13 + $0x88] sm:$0xff] }
 0x1b5   :  { %1297 = vmatpush1.bf16.msra.mxu1 %v1296_v60  ;;  %v774_v60 = vld [vmem:[#allocation11 + $0x120] sm:$0xff] }
 0x1b6   :  { %v1336_v1 = vpack.c.bf16 %v776_v61, %v774_v60  ;;  %v900_v60 = vld [vmem:[#allocation13 + $0x8] sm:$0xff]  ;;  %v917_v61 = vld [vmem:[#allocation13 + $0x90] sm:$0xff] }
 0x24b   :  { %v405_v32 = vpop.f32.mrb[0].mxu1 }
 0x24c   :  { %v406_v33 = vadd.f32 %v405_v32, %v332_v30  ;;  %v407_v34 = vpop.f32.mrb[1].mxu1  ;;  %v760_v32 = vld [vmem:[#allocation11 + $0xb0] sm:$0xff] }
 0x24d   :  { %v408_v35 = vadd.f32 %v407_v34, %v336_v31  ;;  %v765_v34 = vld [vmem:[#allocation11 + $0xd8] sm:$0xff] }
 0x24e   :  { %v416_v38 = vmax.f32 %v406_v33, 0.0  ;;  %v763_v33 = vld [vmem:[#allocation11 + $0xc8] sm:$0xff] }
 0x24f   :  { %v417_v36 = vmax.f32 %v408_v35, 0.0  ;;  %v411_v37 = vpop.f32.mrb[2].mxu1 }
 0x250   :  { %v412_v39 = vadd.f32 %v411_v37, %v332_v30  ;;  %v413_v40 = vpop.f32.mrb[3].mxu1  ;;  %v1318_v30 = vpack.c.bf16 %v761_v28, %v759_v27  ;;  %v762_v37 = vld [vmem:[#allocation11 + $0xc0] sm:$0xff]  ;;  %v484_v27 = vld [vmem:[%s1887_s6] sm:$0x3] }
 0x251   :  { %v414_v41 = vadd.f32 %v413_v40, %v336_v31  ;;  %560 = vmatprep.mubr.f32.mxu0 %v417_v36  ;;  %v758_v31 = vld [vmem:[#allocation11 + $0xa0] sm:$0xff]  ;;  %v1322_v36 = vpack.c.bf16 %v765_v34, %v763_v33  ;;  %v769_v40 = vld [vmem:[#allocation11 + $0xf8] sm:$0xff]  ;;  %v489_v28 = vrot.slane %v484_v27, %v1795_v46 }
 0x252   :  { %561 = vmatmul.mubr.f32.vlgmr.msra.gmra.mrb[4].mxu0 %v416_v38  ;;  %v418_v43 = vmax.f32 %v412_v39, 0.0  ;;  %v1320_v35 = vpack.c.bf16 %v760_v32, %v758_v31  ;;  %v764_v38 = vld [vmem:[#allocation11 + $0xd0] sm:$0xff]  ;;  %v767_v39 = vld [vmem:[#allocation11 + $0xe8] sm:$0xff] }
 0x253   :  { %v419_v42 = vmax.f32 %v414_v41, 0.0  ;;  %1301 = vmatpush1.bf16.msra.mxu0 %v1300_v5  ;;  %v1324_v41 = vpack.c.bf16 %v764_v38, %v762_v37  ;;  %v783_v5 = vld [vmem:[#allocation11 + $0x168] sm:$0xff] }
 0x254   :  { %1303 = vmatprep.subr.bf16.mxu0 %v1302_v6  ;;  %v785_v6 = vld [vmem:[#allocation11 + $0x178] sm:$0xff] }
 0x255   :  { %566 = vmatprep.mubr.f32.mxu0 %v419_v42  ;;  %v1326_v42 = vpack.c.bf16 %v769_v40, %v767_v39  ;;  %v1342_v8 = vpack.c.bf16 %v785_v6, %v783_v5  ;;  %v920_v5 = vld [vmem:[#allocation13 + $0xa8] sm:$0xff] }
 0x256   :  { %567 = vmatmul.mubr.f32.gmra.mrb[6].mxu0 %v418_v43  ;;  %v766_v43 = vld [vmem:[#allocation11 + $0xe0] sm:$0xff] }
 0x257   :  { %1305 = vmatpush1.bf16.msra.mxu0 %v1304_v11  ;;  %v1328_v48 = vpack.c.bf16 %v768_v0, %v766_v43  ;;  %v787_v11 = vld [vmem:[#allocation11 + $0x188] sm:$0xff]  ;;  %v796_v0 = vld [vmem:[#allocation11 + $0x1d0] sm:$0xff] }
 0x258   :  { %1307 = vmatprep.subr.bf16.mxu0 %v1306_v12  ;;  %v789_v12 = vld [vmem:[#allocation11 + $0x198] sm:$0xff] }
 0x259   :  { %v1346_v14 = vpack.c.bf16 %v789_v12, %v787_v11  ;;  %v922_v11 = vld [vmem:[#allocation13 + $0xb8] sm:$0xff] }
 0x25b   :  { %1309 = vmatpush1.bf16.msra.mxu0 %v1308_v17  ;;  %v791_v17 = vld [vmem:[#allocation11 + $0x1a8] sm:$0xff] }
 0x25c   :  { %1311 = vmatprep.subr.bf16.mxu0 %v1310_v18  ;;  %v793_v18 = vld [vmem:[#allocation11 + $0x1b8] sm:$0xff] }
 0x25d   :  { %v1350_v20 = vpack.c.bf16 %v793_v18, %v791_v17  ;;  %v924_v17 = vld [vmem:[#allocation13 + $0xc8] sm:$0xff] }
 0x25f   :  { %1313 = vmatpush1.bf16.msra.mxu0 %v1312_v23  ;;  %v795_v23 = vld [vmem:[#allocation11 + $0x1c8] sm:$0xff] }
 0x260   :  { %1315 = vmatprep.subr.bf16.mxu0 %v1314_v24  ;;  %v797_v24 = vld [vmem:[#allocation11 + $0x1d8] sm:$0xff] }
 0x261   :  { %v1354_v26 = vpack.c.bf16 %v797_v24, %v795_v23  ;;  %v926_v23 = vld [vmem:[#allocation13 + $0xd8] sm:$0xff] }
 0x263   :  { %1317 = vmatpush1.bf16.msra.mxu0 %v1316_v29  ;;  %v493_v29 = vrot.slane %v484_v27, %v1790_v44  ;;  %v910_v27 = vld [vmem:[#allocation13 + $0x58] sm:$0xff] }
 0x264   :  { %1319 = vmatprep.subr.bf16.mxu0 %v1318_v30 }
 0x267   :  { %1321 = vmatpush1.bf16.msra.mxu0 %v1320_v35 }
 0x268   :  { %1323 = vmatprep.subr.bf16.mxu0 %v1322_v36 }
 0x26b   :  { %1325 = vmatpush1.bf16.msra.mxu0 %v1324_v41 }
 0x26c   :  { %1327 = vmatprep.subr.bf16.mxu0 %v1326_v42 }
 0x26f   :  { %1329 = vmatpush1.bf16.msra.mxu0 %v1328_v48  ;;  %v1358_v48 = vpack.c.bf16 %v801_v47, %v799_v45 }
 0x270   :  { %1331 = vmatprep.subr.bf16.mxu0 %v1330_v49  ;;  %v798_v49 = vld [vmem:[#allocation11 + $0x1e0] sm:$0xff] }
 0x271   :  { %v1360_v53 = vpack.c.bf16 %v800_v50, %v798_v49  ;;  %v927_v49 = vld [vmem:[#allocation13 + $0xe0] sm:$0xff]  ;;  %v928_v50 = vld [vmem:[#allocation13 + $0xe8] sm:$0xff] }
 0x273   :  { %1333 = vmatpush1.bf16.msra.mxu0 %v1332_v58  ;;  %v899_v58 = vld [vmem:[#allocation13] sm:$0xff] }
 0x274   :  { %1335 = vmatprep.subr.bf16.mxu0 %v1334_v59  ;;  %v1362_v59 = vpack.c.bf16 %v916_v57, %v915_v54  ;;  %v1364_v63 = vpack.c.bf16 %v900_v60, %v899_v58  ;;  %v911_v54 = vld [vmem:[#allocation13 + $0x60] sm:$0xff]  ;;  %v912_v57 = vld [vmem:[#allocation13 + $0x68] sm:$0xff]  ;;  %v930_v60 = vld [vmem:[#allocation13 + $0xf8] sm:$0xff] }
 0x275   :  { %v1388_v58 = vpack.c.bf16 %v912_v57, %v911_v54 }
 0x276   :  { %1363 = vmatprep.subr.bf16.mxu1 %v1362_v59  ;;  %v929_v59 = vld [vmem:[#allocation13 + $0xf0] sm:$0xff] }
 0x277   :  { %1337 = vmatpush1.bf16.msra.mxu0 %v1336_v1  ;;  %v1366_v1 = vpack.c.bf16 %v918_v62, %v917_v61  ;;  %v1390_v61 = vpack.c.bf16 %v930_v60, %v929_v59  ;;  %v913_v62 = vld [vmem:[#allocation13 + $0x70] sm:$0xff] }
 0x278   :  { %1339 = vmatprep.subr.bf16.mxu0 %v1338_v2  ;;  %v901_v2 = vld [vmem:[#allocation13 + $0x10] sm:$0xff] }
 0x279   :  { %v1368_v6 = vpack.c.bf16 %v902_v3, %v901_v2  ;;  %v802_v2 = vld [vmem:[%s1891_s10] sm:$0x3] }
 0x27a   :  { %v807_v3 = vrot.slane %v802_v2, %v1795_v46 }
 0x27b   :  { %1341 = vmatpush1.bf16.msra.mxu0 %v1340_v7  ;;  %v1370_v7 = vpack.c.bf16 %v920_v5, %v919_v4  ;;  %v811_v4 = vrot.slane %v802_v2, %v1790_v44 }
 0x27c   :  { %1343 = vmatprep.subr.bf16.mxu0 %v1342_v8  ;;  %v903_v8 = vld [vmem:[#allocation13 + $0x20] sm:$0xff] }
 0x27d   :  { %v1372_v12 = vpack.c.bf16 %v904_v9, %v903_v8 }
 0x27f   :  { %1345 = vmatpush1.bf16.msra.mxu0 %v1344_v13  ;;  %v1374_v13 = vpack.c.bf16 %v922_v11, %v921_v10 }
 0x280   :  { %1347 = vmatprep.subr.bf16.mxu0 %v1346_v14  ;;  %v905_v14 = vld [vmem:[#allocation13 + $0x30] sm:$0xff] }
 0x281   :  { %v1376_v18 = vpack.c.bf16 %v906_v15, %v905_v14 }
 0x283   :  { %1349 = vmatpush1.bf16.msra.mxu0 %v1348_v19  ;;  %v1378_v19 = vpack.c.bf16 %v924_v17, %v923_v16 }
 0x284   :  { %1351 = vmatprep.subr.bf16.mxu0 %v1350_v20  ;;  %v907_v20 = vld [vmem:[#allocation13 + $0x40] sm:$0xff] }
 0x285   :  { %v1380_v24 = vpack.c.bf16 %v908_v21, %v907_v20 }
 0x287   :  { %1353 = vmatpush1.bf16.msra.mxu0 %v1352_v25  ;;  %v1382_v25 = vpack.c.bf16 %v926_v23, %v925_v22 }
 0x288   :  { %1355 = vmatprep.subr.bf16.mxu0 %v1354_v26  ;;  %v909_v26 = vld [vmem:[#allocation13 + $0x50] sm:$0xff] }
 0x325   :  { %v562_v30 = vpop.f32.mrb[4].mxu0 }
 0x326   :  { %v563_v31 = vadd.f32 %v562_v30, %v489_v28  ;;  %v564_v32 = vpop.f32.mrb[5].mxu0 }
 0x327   :  { %v565_v33 = vadd.f32 %v564_v32, %v493_v29 }
 0x328   :  { %v1822_v34 = vadd.f32 %v563_v31, %v1801_v52 }
 0x329   :  { %v1825_v35 = vadd.f32 %v565_v33, %v1799_v51  ;;  %v568_v36 = vpop.f32.mrb[6].mxu0 }
 0x32a   :  { %v569_v37 = vadd.f32 %v568_v36, %v489_v28  ;;  %v570_v38 = vpop.f32.mrb[7].mxu0  ;;  %v577_v41 = vmax.f32 %v1822_v34, 0.0  ;;  %v1384_v28 = vpack.c.bf16 %v910_v27, %v909_v26 }
 0x32b   :  { %v578_v39 = vmax.f32 %v1825_v35, 0.0  ;;  %v571_v40 = vadd.f32 %v570_v38, %v493_v29  ;;  %v645_v29 = vld [vmem:[%s1889_s8] sm:$0x3] }
 0x32c   :  { %v1830_v42 = vadd.f32 %v569_v37, %v1807_v56  ;;  %v794_v56 = vld [vmem:[#allocation11 + $0x1c0] sm:$0xff]  ;;  %v650_v30 = vrot.slane %v645_v29, %v1795_v46  ;;  %v654_v31 = vrot.slane %v645_v29, %v1790_v44 }
 0x32d   :  { %v1833_v43 = vadd.f32 %v571_v40, %v1805_v55  ;;  %721 = vmatprep.mubr.f32.mxu1 %v578_v39  ;;  %v1356_v55 = vpack.c.bf16 %v796_v0, %v794_v56 }
 0x32e   :  { %722 = vmatmul.mubr.f32.vlgmr.msra.gmra.mrb[4].mxu1 %v577_v41  ;;  %v579_v52 = vmax.f32 %v1830_v42, 0.0 }
 0x32f   :  { %v580_v51 = vmax.f32 %v1833_v43, 0.0  ;;  %1357 = vmatpush1.bf16.msra.mxu0 %v1356_v55  ;;  %1365 = vmatpush3.bf16.msra.mxu1 %v1364_v63  ;;  %v914_v63 = vld [vmem:[#allocation13 + $0x78] sm:$0xff] }
 0x330   :  { %1359 = vmatprep.subr.bf16.mxu0 %v1358_v48  ;;  %1367 = vmatprep.subr.bf16.mxu1 %v1366_v1  ;;  %v1392_v1 = vpack.c.bf16 %v914_v63, %v913_v62 }
 0x331   :  { %727 = vmatprep.mubr.f32.mxu1 %v580_v51 }
 0x332   :  { %728 = vmatmul.mubr.f32.gmra.mrb[6].mxu1 %v579_v52 }
 0x333   :  { %1361 = vmatpush1.bf16.msra.mxu0 %v1360_v53  ;;  %1369 = vmatpush3.bf16.msra.mxu1 %v1368_v6  ;;  %v1386_v53 = vpack.c.bf16 %v928_v50, %v927_v49 }
 0x334   :  { %1371 = vmatprep.subr.bf16.mxu1 %v1370_v7 }
 0x337   :  { %1373 = vmatpush3.bf16.msra.mxu1 %v1372_v12 }
 0x338   :  { %1375 = vmatprep.subr.bf16.mxu1 %v1374_v13 }
 0x33b   :  { %1377 = vmatpush3.bf16.msra.mxu1 %v1376_v18 }
 0x33c   :  { %1379 = vmatprep.subr.bf16.mxu1 %v1378_v19 }
 0x33f   :  { %1381 = vmatpush3.bf16.msra.mxu1 %v1380_v24 }
 0x340   :  { %1383 = vmatprep.subr.bf16.mxu1 %v1382_v25 }
 0x343   :  { %1385 = vmatpush3.bf16.msra.mxu1 %v1384_v28 }
 0x344   :  { %1387 = vmatprep.subr.bf16.mxu1 %v1386_v53 }
 0x347   :  { %1389 = vmatpush3.bf16.msra.mxu1 %v1388_v58 }
 0x348   :  { %1391 = vmatprep.subr.bf16.mxu1 %v1390_v61 }
 0x34b   :  { %1393 = vmatpush3.bf16.msra.mxu1 %v1392_v1 }
 0x401   :  { %v723_v32 = vpop.f32.mrb[4].mxu1 }
 0x402   :  { %v724_v33 = vadd.f32 %v723_v32, %v650_v30  ;;  %v725_v36 = vpop.f32.mrb[5].mxu1 }
 0x403   :  { %v726_v37 = vadd.f32 %v725_v36, %v654_v31 }
 0x404   :  { %v734_v56 = vmax.f32 %v724_v33, 0.0 }
 0x405   :  { %v735_v38 = vmax.f32 %v726_v37, 0.0  ;;  %v729_v40 = vpop.f32.mrb[6].mxu1 }
 0x406   :  { %v730_v0 = vadd.f32 %v729_v40, %v650_v30  ;;  %v731_v55 = vpop.f32.mrb[7].mxu1 }
 0x407   :  { %v732_v45 = vadd.f32 %v731_v55, %v654_v31  ;;  %878 = vmatprep.mubr.f32.mxu0 %v735_v38 }
 0x408   :  { %879 = vmatmul.mubr.f32.vlgmr.msra.gmra.mrb[8].mxu0 %v734_v56  ;;  %v736_v48 = vmax.f32 %v730_v0, 0.0 }
 0x409   :  { %v737_v47 = vmax.f32 %v732_v45, 0.0 }
 0x40b   :  { %884 = vmatprep.mubr.f32.mxu0 %v737_v47 }
 0x40c   :  { %885 = vmatmul.mubr.f32.gmra.mrb[10].mxu0 %v736_v48 }
 0x4db   :  { %v880_v5 = vpop.f32.mrb[8].mxu0 }
 0x4dc   :  { %v881_v6 = vadd.f32 %v880_v5, %v807_v3  ;;  %v882_v7 = vpop.f32.mrb[9].mxu0 }
 0x4dd   :  { %v883_v8 = vadd.f32 %v882_v7, %v811_v4 }
 0x4de   :  { %v891_v9 = vadd.f32 %v881_v6, %v577_v41 }
 0x4df   :  { %v892_v10 = vadd.f32 %v883_v8, %v578_v39  ;;  %v886_v11 = vpop.f32.mrb[10].mxu0  ;;  %v1035_v39 = vld [vmem:[%s1893_s12] ss:$0 sm:$0xff] }
 0x4e0   :  { %v887_v12 = vadd.f32 %v886_v11, %v807_v3  ;;  %v888_v13 = vpop.f32.mrb[11].mxu0  ;;  %v895_v16 = vmax.f32 %v891_v9, 0.0 }
 0x4e1   :  { %v896_v14 = vmax.f32 %v892_v10, 0.0  ;;  %v889_v15 = vadd.f32 %v888_v13, %v811_v4 }
 0x4e2   :  { %v893_v46 = vadd.f32 %v887_v12, %v579_v52 }
 0x4e3   :  { %v894_v44 = vadd.f32 %v889_v15, %v580_v51  ;;  %1002 = vmatprep.mubr.f32.mxu1 %v896_v14 }
 0x4e4   :  { %1003 = vmatmul.mubr.f32.vlgmr.msra.gmra.mrb[8].mxu1 %v895_v16  ;;  %v897_v34 = vmax.f32 %v893_v46, 0.0 }
 0x4e5   :  { %v898_v17 = vmax.f32 %v894_v44, 0.0 }
 0x4e7   :  { %1007 = vmatprep.mubr.f32.mxu1 %v898_v17 }
 0x4e8   :  { %1008 = vmatmul.mubr.f32.gmra.mrb[10].mxu1 %v897_v34 }
 0x5b7   :  { %v1068_v35 = vpop.f32.mrb[8].mxu1 }
 0x5b8   :  { %v1069_v41 = vpop.f32.mrb[9].mxu1 }
 0x5b9   :  { %v1070_v18 = vadd.f32 %v1069_v41, %v1068_v35 }
 0x5bb   :  { %v1005_v19 = vadd.f32 %v1070_v18, %v1035_v39  ;;  %v1071_v20 = vpop.f32.mrb[10].mxu1 }
 0x5bc   :  { %v1072_v42 = vpop.f32.mrb[11].mxu1 }
 0x5bd   :  { %1013 = vst [vmem:[#allocation14] sm:$0xff] %v1005_v19  ;;  %v1073_v43 = vadd.f32 %v1072_v42, %v1071_v20 }
 0x5bf   :  { %v1010_v51 = vadd.f32 %v1073_v43, %v1035_v39 }
 0x5c1   :  { %1014 = vst [vmem:[#allocation14 + $0x8] sm:$0xff] %v1010_v51 }
 0x5c2   :  { %1572 = shalt.err (!%p1569_p4)
}
 0x5c3   :  { %s1573_s17 = scalar_lea.hbm %s1894_s13, 256 }
 0x5c4   :  { %p1574_p5 = scmp.ne.s32.totalorder %s1894_s13, %s1573_s17  ;;  %p1577_p6 = scmp.lt.u32.totalorder %s1573_s17, %s1894_s13 }
 0x5c6   :  { %p1579_p7 = pnand %p1577_p6, %p1574_p5 }
 0x5c8   :  { %1582 = shalt.err (!%p1579_p7)
}
 0x5c9   :  { %1026 = dma.vmem_to_hbm [thread:$0]  %s1021_s3, 256, %s1894_s13, [#allocation4], %s1599_s9, %s1599_s9, %s1600_s25  }
 0x5ca   :  { %1591 = dma.done.wait [#allocation4], 256  }
 0x5cb   :  { %1592 = vsyncadd [#allocation4], 4294967040 }
 0x5cc   :  { %1030 = vsyncpa [#allocation3], 1 }
 0x5cd   :  { %1031 = vsyncpa [#allocation6], 1 }
 0x5ce   :  { %1032 = vsyncpa [#allocation9], 1 }
 0x5cf   :  { %1033 = vsyncpa [#allocation12], 1 }
 0x5d0   :  { %1034 = vsyncpa [#allocation4], 1 }

</bundles_post_ra>
